<compile_context>
chip_gen: v6e
topology: v6e:2x2x1
jax: 0.10.0
libtpu: 0.0.40
codegen_flags: <defaults>
</compile_context>

<pallas_src>
import functools
import math

import jax
import jax.numpy as jnp
from jax.experimental import pallas as pl
from jax.experimental.pallas import tpu as pltpu

EPS = 1e-5


def _layernorm(x, w, b):
    mu = jnp.mean(x, axis=-1, keepdims=True)
    xc = x - mu
    var = jnp.mean(xc * xc, axis=-1, keepdims=True)
    return xc * jax.lax.rsqrt(var + EPS) * w + b


# ------------------------- fused Pallas kernel -------------------------

def encoder_stack_kernel(n_head,
                         x_ref,
                         ln1w_ref, ln1b_ref,
                         wqkv_ref, bqkv_ref,
                         wo_ref, bo_ref,
                         ln2w_ref, ln2b_ref,
                         wfc_ref, bfc_ref, wpr_ref, bpr_ref,
                         nw_ref, nb_ref,
                         o_ref,
                         act_ref):
    """One grid step == (one batch tile, one encoder layer)."""
    layer = pl.program_id(1)
    n_layer = pl.num_programs(1)

    TB, T, C = x_ref.shape
    N = TB * T
    H = n_head
    hd = C // H
    scale = 1.0 / math.sqrt(hd)
    wdt = wqkv_ref.dtype           # weight storage dtype (f32, or bf16 on v6e/v7x)

    # Load this batch tile's input into the resident VMEM scratch at layer 0.
    @pl.when(layer == 0)
    def _():
        act_ref[...] = x_ref[...].reshape(N, C).astype(jnp.float32)

    x = act_ref[...]                                     # (N, C) f32, resident

    # ---- LayerNorm 1 (residual below wraps the post-LN1 activation, exactly
    #      matching the PyTorch module's forward) ----
    h = _layernorm(x, ln1w_ref[0], ln1b_ref[0])          # (N, C)

    # ---- fused, lane-dense QKV projection: one (N,C) @ (C,3C) matmul ----
    qkv = jnp.dot(h.astype(wdt), wqkv_ref[0],
                  preferred_element_type=jnp.float32) + bqkv_ref[0]   # (N, 3C)

    # ---- attention core: per (batch-in-tile, head); scale=1/sqrt(hd),
    #      non-causal, exact softmax.  hd-deep score/PV matmuls are inherent to
    #      the math; everything wide stays merged-C. ----
    # TODO(synk): for large T convert this to an online-softmax KV-tile loop
    #             instead of materializing per-head (T, T) scores.
    rows = []
    for b in range(TB):
        r0 = b * T
        heads = []
        for hh in range(H):
            c0 = hh * hd
            q = qkv[r0:r0 + T, c0:c0 + hd]                       # (T, hd)
            k = qkv[r0:r0 + T, C + c0:C + c0 + hd]               # (T, hd)
            v = qkv[r0:r0 + T, 2 * C + c0:2 * C + c0 + hd]       # (T, hd)
            s = jnp.einsum('qd,kd->qk', q, k,
                           preferred_element_type=jnp.float32) * scale
            s = s - jnp.max(s, axis=-1, keepdims=True)
            p = jnp.exp(s)
            p = p / jnp.sum(p, axis=-1, keepdims=True)           # exact divide
            heads.append(jnp.dot(p, v, preferred_element_type=jnp.float32))
        rows.append(jnp.concatenate(heads, axis=-1))             # (T, C)
    attn = jnp.concatenate(rows, axis=0) if TB > 1 else rows[0]  # (N, C)

    # ---- single full-C output projection (head-concat already merged) ----
    y = jnp.dot(attn.astype(wdt), wo_ref[0],
                preferred_element_type=jnp.float32) + bo_ref[0]  # (N, C)

    x1 = h + y                                           # attention residual

    # ---- MLP block ----
    h2 = _layernorm(x1, ln2w_ref[0], ln2b_ref[0])
    m = jnp.dot(h2.astype(wdt), wfc_ref[0],
                preferred_element_type=jnp.float32) + bfc_ref[0]
    m = jnp.maximum(m, 0.0)                              # ReLU
    m = jnp.dot(m.astype(wdt), wpr_ref[0],
                preferred_element_type=jnp.float32) + bpr_ref[0]

    out = x1 + m
    act_ref[...] = out                                   # carry to next layer

    # ---- output writeback ONLY on the last layer step (final LN fused);
    #      intermediate stores were dead (same output block index across the
    #      layer axis) and have been removed. ----
    @pl.when(layer == n_layer - 1)
    def _():
        o_ref[...] = _layernorm(out, nw_ref[...], nb_ref[...]) \
            .reshape(TB, T, C).astype(o_ref.dtype)


# ------------------------- wrapper -------------------------

def encoder_forward_pallas(x, layer_params, norm_w, norm_b, n_head,
                           batch_tile=None, param_dtype=jnp.float32):
    B, T, C = x.shape
    L = len(layer_params)
    f32 = jnp.float32

    # Batch tile: largest divisor of B up to 8 (amortizes weight DMA, raises
    # MXU M-dim).  On v7x pick it so B // TB stays a multiple of 2 if possible.
    if batch_tile is None:
        batch_tile = 1
        for cand in range(min(B, 8), 0, -1):
            if B % cand == 0:
                batch_tile = cand
                break
    TB = batch_tile
    assert B % TB == 0, "batch_tile must divide batch size"

    # ---- stack per-layer weights with a leading L axis (layer-streamed via
    #      BlockSpec pipelining).  QKV pre-concatenated -> lane-dense matmul. ----
    stack = lambda f: jnp.stack([f(p) for p in layer_params], axis=0)

    ln1_w = stack(lambda p: p['ln1_w'].reshape(1, C).astype(f32))
    ln1_b = stack(lambda p: p['ln1_b'].reshape(1, C).astype(f32))
    w_qkv = stack(lambda p: jnp.concatenate(
        [p['wq'], p['wk'], p['wv']], axis=-1).astype(param_dtype))      # (L, C, 3C)
    b_qkv = stack(lambda p: jnp.concatenate(
        [p['bq'], p['bk'], p['bv']]).reshape(1, 3 * C).astype(f32))
    wo = stack(lambda p: p['wo'].astype(param_dtype))                    # (L, C, C)
    bo = stack(lambda p: p['bo'].reshape(1, C).astype(f32))
    ln2_w = stack(lambda p: p['ln2_w'].reshape(1, C).astype(f32))
    ln2_b = stack(lambda p: p['ln2_b'].reshape(1, C).astype(f32))
    wfc = stack(lambda p: p['wfc'].astype(param_dtype))                  # (L, C, 4C)
    bfc = stack(lambda p: p['bfc'].reshape(1, 4 * C).astype(f32))
    wpr = stack(lambda p: p['wpr'].astype(param_dtype))                  # (L, 4C, C)
    bpr = stack(lambda p: p['bpr'].reshape(1, C).astype(f32))
    nw = norm_w.reshape(1, C).astype(f32)
    nb = norm_b.reshape(1, C).astype(f32)

    stacked = [ln1_w, ln1_b, w_qkv, b_qkv, wo, bo,
               ln2_w, ln2_b, wfc, bfc, wpr, bpr]

    def layer_spec(a):        # stacked per-layer tensor: select layer l
        nd = a.ndim
        return pl.BlockSpec((1,) + a.shape[1:],
                            lambda bt, l, _n=nd: (l,) + (0,) * (_n - 1))

    def const_spec(a):        # final-norm params: same block every step
        nd = a.ndim
        return pl.BlockSpec(a.shape, lambda bt, l, _n=nd: (0,) * _n)

    in_specs = ([pl.BlockSpec((TB, T, C), lambda bt, l: (bt, 0, 0))]
                + [layer_spec(a) for a in stacked]
                + [const_spec(nw), const_spec(nb)])

    grid_spec = pltpu.PrefetchScalarGridSpec(
        num_scalar_prefetch=0,
        grid=(B // TB, L),                 # batch tiles parallel, layers fused
        in_specs=in_specs,
        out_specs=pl.BlockSpec((TB, T, C), lambda bt, l: (bt, 0, 0)),
        scratch_shapes=[pltpu.VMEM((TB * T, C), jnp.float32)],  # resident act
    )

    # Explicit scoped-VMEM budget: 2x (double-buffered) per-layer weight block
    # + in/out activation blocks + resident scratch, with headroom; capped at
    # 64 MiB so it is valid on v7x as well as v5e/v6e.
    # TODO(synk): at large C on v7x, additionally tile the MLP hidden dim (wfc/
    #             wpr blocks) or use pipeline_mode=pl.Buffered(1) for them.
    per_layer_bytes = sum(int(a[0].size) * a.dtype.itemsize for a in stacked)
    act_block_bytes = TB * T * C * x.dtype.itemsize
    scratch_bytes = TB * T * C * 4
    needed = 2 * per_layer_bytes + 4 * act_block_bytes + scratch_bytes
    vmem_limit = int(min(64 * 2 ** 20, max(32 * 2 ** 20, 2 * needed)))

    return pl.pallas_call(
        functools.partial(encoder_stack_kernel, n_head),
        out_shape=jax.ShapeDtypeStruct((B, T, C), x.dtype),
        grid_spec=grid_spec,
        compiler_params=pltpu.CompilerParams(
            dimension_semantics=("parallel", "arbitrary"),
            vmem_limit_bytes=vmem_limit),
    )(x, *stacked, nw, nb)


# ------------------------- pure-JAX reference (for verification) -------------------------

def _ref_ln(x, w, b):
    mu = x.mean(-1, keepdims=True)
    var = ((x - mu) ** 2).mean(-1, keepdims=True)
    return (x - mu) / jnp.sqrt(var + EPS) * w + b


def _ref_layer(x, p, n_head):
    B, T, C = x.shape
    hd = C // n_head
    h = _ref_ln(x, p['ln1_w'], p['ln1_b'])
    q = h @ p['wq'] + p['bq']
    k = h @ p['wk'] + p['bk']
    v = h @ p['wv'] + p['bv']
    split = lambda t: t.reshape(B, T, n_head, hd).transpose(0, 2, 1, 3)
    q, k, v = split(q), split(k), split(v)
    s = jnp.einsum('bhqd,bhkd->bhqk', q, k) / jnp.sqrt(hd)
    a = jax.nn.softmax(s, axis=-1)
    y = jnp.einsum('bhqk,bhkd->bhqd', a, v).transpose(0, 2, 1, 3).reshape(B, T, C)
    y = y @ p['wo'] + p['bo']
    x1 = h + y
    h2 = _ref_ln(x1, p['ln2_w'], p['ln2_b'])
    m = jnp.maximum(h2 @ p['wfc'] + p['bfc'], 0.0) @ p['wpr'] + p['bpr']
    return x1 + m


def encoder_forward_ref(x, layer_params, norm_w, norm_b, n_head):
    for p in layer_params:
        x = _ref_layer(x, p, n_head)
    return _ref_ln(x, norm_w, norm_b)


# ------------------------- main -------------------------

if __name__ == "__main__":
    # config: n_layer=2, n_head=4, n_embd=32, block_size(T)=8, bias=True, dropout=0.0
    B, T, C, n_head, n_layer = 2, 8, 32, 4, 2

    key = jax.random.PRNGKey(0)
    kx, *layer_keys = jax.random.split(key, 1 + n_layer + 1)
    knorm = layer_keys[-1]
    layer_keys = layer_keys[:-1]

    x = jax.random.normal(kx, (B, T, C), jnp.float32)

    def lin(k, fin, fout):
        return 0.02 * jax.random.normal(k, (fin, fout), jnp.float32)

    def init_layer(k):
        ks = jax.random.split(k, 16)
        return dict(
            ln1_w=1.0 + 0.1 * jax.random.normal(ks[0], (C,), jnp.float32),
            ln1_b=0.1 * jax.random.normal(ks[1], (C,), jnp.float32),
            wq=lin(ks[2], C, C), bq=0.01 * jax.random.normal(ks[3], (C,), jnp.float32),
            wk=lin(ks[4], C, C), bk=0.01 * jax.random.normal(ks[5], (C,), jnp.float32),
            wv=lin(ks[6], C, C), bv=0.01 * jax.random.normal(ks[7], (C,), jnp.float32),
            wo=lin(ks[8], C, C), bo=0.01 * jax.random.normal(ks[9], (C,), jnp.float32),
            ln2_w=1.0 + 0.1 * jax.random.normal(ks[10], (C,), jnp.float32),
            ln2_b=0.1 * jax.random.normal(ks[11], (C,), jnp.float32),
            wfc=lin(ks[12], C, 4 * C), bfc=0.01 * jax.random.normal(ks[13], (4 * C,), jnp.float32),
            wpr=lin(ks[14], 4 * C, C), bpr=0.01 * jax.random.normal(ks[15], (C,), jnp.float32),
        )

    layer_params = [init_layer(k) for k in layer_keys]
    kn1, kn2 = jax.random.split(knorm)
    norm_w = 1.0 + 0.1 * jax.random.normal(kn1, (C,), jnp.float32)
    norm_b = 0.1 * jax.random.normal(kn2, (C,), jnp.float32)

    # f32 weights here for tight parity with the reference; pass
    # param_dtype=jnp.bfloat16 on v6e/v7x for MXU throughput / halved weight DMA.
    out = encoder_forward_pallas(x, layer_params, norm_w, norm_b, n_head)
    out = jax.block_until_ready(out)

    ref = encoder_forward_ref(x, layer_params, norm_w, norm_b, n_head)
    max_err = float(jnp.max(jnp.abs(out - ref)))
    # exact softmax division (no approx EUP reciprocal) -> typical error ~1e-5
    assert max_err < 5e-4, f"mismatch vs reference: {max_err}"

    print("KERNEL_OK")
</pallas_src>

<mosaic_0001>
module attributes {stable_mosaic.version = 11 : i64} {
  func.func @encoder_stack_kernel(%arg0: i32, %arg1: i32, %arg2: memref<2x8x32xf32, #tpu.memory_space<vmem>>, %arg3: memref<1x1x32xf32, #tpu.memory_space<vmem>>, %arg4: memref<1x1x32xf32, #tpu.memory_space<vmem>>, %arg5: memref<1x32x96xf32, #tpu.memory_space<vmem>>, %arg6: memref<1x1x96xf32, #tpu.memory_space<vmem>>, %arg7: memref<1x32x32xf32, #tpu.memory_space<vmem>>, %arg8: memref<1x1x32xf32, #tpu.memory_space<vmem>>, %arg9: memref<1x1x32xf32, #tpu.memory_space<vmem>>, %arg10: memref<1x1x32xf32, #tpu.memory_space<vmem>>, %arg11: memref<1x32x128xf32, #tpu.memory_space<vmem>>, %arg12: memref<1x1x128xf32, #tpu.memory_space<vmem>>, %arg13: memref<1x128x32xf32, #tpu.memory_space<vmem>>, %arg14: memref<1x1x32xf32, #tpu.memory_space<vmem>>, %arg15: memref<1x32xf32, #tpu.memory_space<vmem>>, %arg16: memref<1x32xf32, #tpu.memory_space<vmem>>, %arg17: memref<2x8x32xf32, #tpu.memory_space<vmem>>, %arg18: memref<16x32xf32, #tpu.memory_space<vmem>>) attributes {dimension_semantics = [#tpu.dimension_semantics<parallel>, #tpu.dimension_semantics<arbitrary>], iteration_bounds = array<i64: 1, 2>, scalar_prefetch = 0 : i64, scratch_operands = 1 : i64, tpu.core_type = #tpu.core_type<tc>, window_params = [{transform_indices = @transform_0, window_bounds = array<i64: 2, 8, 32>}, {transform_indices = @transform_1, window_bounds = array<i64: 1, 1, 32>}, {transform_indices = @transform_2, window_bounds = array<i64: 1, 1, 32>}, {transform_indices = @transform_3, window_bounds = array<i64: 1, 32, 96>}, {transform_indices = @transform_4, window_bounds = array<i64: 1, 1, 96>}, {transform_indices = @transform_5, window_bounds = array<i64: 1, 32, 32>}, {transform_indices = @transform_6, window_bounds = array<i64: 1, 1, 32>}, {transform_indices = @transform_7, window_bounds = array<i64: 1, 1, 32>}, {transform_indices = @transform_8, window_bounds = array<i64: 1, 1, 32>}, {transform_indices = @transform_9, window_bounds = array<i64: 1, 32, 128>}, {transform_indices = @transform_10, window_bounds = array<i64: 1, 1, 128>}, {transform_indices = @transform_11, window_bounds = array<i64: 1, 128, 32>}, {transform_indices = @transform_12, window_bounds = array<i64: 1, 1, 32>}, {pipeline_mode = #tpu.pipeline_mode<synchronous>, transform_indices = @transform_13, window_bounds = array<i64: 1, 32>}, {pipeline_mode = #tpu.pipeline_mode<synchronous>, transform_indices = @transform_14, window_bounds = array<i64: 1, 32>}, {transform_indices = @transform_15, window_bounds = array<i64: 2, 8, 32>}]} {
    %c0_i32 = arith.constant 0 : i32
    %0 = arith.cmpi eq, %arg1, %c0_i32 : i32
    %1 = arith.extui %0 : i1 to i32
    %c0_i32_0 = arith.constant 0 : i32
    %2 = arith.cmpi ne, %1, %c0_i32_0 : i32
    scf.if %2 {
      %c0_95 = arith.constant 0 : index
      %c0_96 = arith.constant 0 : index
      %c0_97 = arith.constant 0 : index
      %219 = vector.load %arg2[%c0_95, %c0_96, %c0_97] : memref<2x8x32xf32, #tpu.memory_space<vmem>>, vector<2x8x32xf32>
      %220 = vector.shape_cast %219 : vector<2x8x32xf32> to vector<16x32xf32>
      %c0_98 = arith.constant 0 : index
      %c0_99 = arith.constant 0 : index
      %221 = vector.load %arg18[%c0_98, %c0_99] : memref<16x32xf32, #tpu.memory_space<vmem>>, vector<16x32xf32>
      tpu.vector_store %arg18[%c0_98, %c0_99], %220 {strides = array<i32>} : memref<16x32xf32, #tpu.memory_space<vmem>>, vector<16x32xf32>,
    } else {
    }
    %c0 = arith.constant 0 : index
    %c0_1 = arith.constant 0 : index
    %3 = vector.load %arg18[%c0, %c0_1] : memref<16x32xf32, #tpu.memory_space<vmem>>, vector<16x32xf32>
    %c0_2 = arith.constant 0 : index
    %c0_3 = arith.constant 0 : index
    %c0_4 = arith.constant 0 : index
    %4 = vector.load %arg3[%c0_2, %c0_3, %c0_4] : memref<1x1x32xf32, #tpu.memory_space<vmem>>, vector<1x1x32xf32>
    %5 = vector.shape_cast %4 : vector<1x1x32xf32> to vector<1x32xf32>
    %c0_5 = arith.constant 0 : index
    %c0_6 = arith.constant 0 : index
    %c0_7 = arith.constant 0 : index
    %6 = vector.load %arg4[%c0_5, %c0_6, %c0_7] : memref<1x1x32xf32, #tpu.memory_space<vmem>>, vector<1x1x32xf32>
    %7 = vector.shape_cast %6 : vector<1x1x32xf32> to vector<1x32xf32>
    %cst = arith.constant dense<0.000000e+00> : vector<16xf32>
    %8 = vector.multi_reduction <add>, %3, %cst [1] : vector<16x32xf32> to vector<16xf32>
    %9 = vector.shape_cast %8 : vector<16xf32> to vector<16x1xf32>
    %cst_8 = arith.constant 3.200000e+01 : f32
    %10 = vector.broadcast %cst_8 : f32 to vector<16x1xf32>
    %11 = arith.divf %9, %10 : vector<16x1xf32>
    %12 = vector.broadcast %11 : vector<16x1xf32> to vector<16x32xf32>
    %13 = arith.subf %3, %12 : vector<16x32xf32>
    %14 = arith.mulf %13, %13 : vector<16x32xf32>
    %cst_9 = arith.constant dense<0.000000e+00> : vector<16xf32>
    %15 = vector.multi_reduction <add>, %14, %cst_9 [1] : vector<16x32xf32> to vector<16xf32>
    %16 = vector.shape_cast %15 : vector<16xf32> to vector<16x1xf32>
    %cst_10 = arith.constant 3.200000e+01 : f32
    %17 = vector.broadcast %cst_10 : f32 to vector<16x1xf32>
    %18 = arith.divf %16, %17 : vector<16x1xf32>
    %cst_11 = arith.constant 9.99999974E-6 : f32
    %19 = vector.broadcast %cst_11 : f32 to vector<16x1xf32>
    %20 = arith.addf %18, %19 : vector<16x1xf32>
    %21 = math.rsqrt %20 : vector<16x1xf32>
    %22 = vector.broadcast %21 : vector<16x1xf32> to vector<16x32xf32>
    %23 = arith.mulf %13, %22 : vector<16x32xf32>
    %24 = vector.broadcast %5 : vector<1x32xf32> to vector<16x32xf32>
    %25 = arith.mulf %23, %24 : vector<16x32xf32>
    %26 = vector.broadcast %7 : vector<1x32xf32> to vector<16x32xf32>
    %27 = arith.addf %25, %26 : vector<16x32xf32>
    %c0_12 = arith.constant 0 : index
    %c0_13 = arith.constant 0 : index
    %c0_14 = arith.constant 0 : index
    %28 = vector.load %arg5[%c0_12, %c0_13, %c0_14] : memref<1x32x96xf32, #tpu.memory_space<vmem>>, vector<1x32x96xf32>
    %29 = vector.shape_cast %28 : vector<1x32x96xf32> to vector<32x96xf32>
    %cst_15 = arith.constant dense<0.000000e+00> : vector<16x96xf32>
    %30 = tpu.matmul %27, %29, %cst_15 {dimension_numbers = #tpu.dot_dimension_numbers<[1], [0], [0], [1], [0, 0, 1, 1], [], []>} : vector<16x32xf32>, vector<32x96xf32>, vector<16x96xf32> -> vector<16x96xf32>
    %c0_16 = arith.constant 0 : index
    %c0_17 = arith.constant 0 : index
    %c0_18 = arith.constant 0 : index
    %31 = vector.load %arg6[%c0_16, %c0_17, %c0_18] : memref<1x1x96xf32, #tpu.memory_space<vmem>>, vector<1x1x96xf32>
    %32 = vector.shape_cast %31 : vector<1x1x96xf32> to vector<1x96xf32>
    %33 = vector.broadcast %32 : vector<1x96xf32> to vector<16x96xf32>
    %34 = arith.addf %30, %33 : vector<16x96xf32>
    %35 = vector.extract_strided_slice %34 {offsets = [0, 0], sizes = [8, 8], strides = [1, 1]} : vector<16x96xf32> to vector<8x8xf32>
    %36 = vector.extract_strided_slice %34 {offsets = [0, 32], sizes = [8, 8], strides = [1, 1]} : vector<16x96xf32> to vector<8x8xf32>
    %37 = vector.extract_strided_slice %34 {offsets = [0, 64], sizes = [8, 8], strides = [1, 1]} : vector<16x96xf32> to vector<8x8xf32>
    "tpu.trace_start"() <{level = 10 : i32, message = "qd,kd->qk"}> : () -> ()
    %cst_19 = arith.constant dense<0.000000e+00> : vector<8x8xf32>
    %38 = tpu.matmul %35, %36, %cst_19 {dimension_numbers = #tpu.dot_dimension_numbers<[1], [1], [0], [0], [0, 0, 1, 0], [], []>} : vector<8x8xf32>, vector<8x8xf32>, vector<8x8xf32> -> vector<8x8xf32>
    "tpu.trace_stop"() : () -> ()
    %cst_20 = arith.constant 0.353553385 : f32
    %39 = vector.broadcast %cst_20 : f32 to vector<8x8xf32>
    %40 = arith.mulf %38, %39 : vector<8x8xf32>
    %cst_21 = arith.constant dense<0xFF800000> : vector<8xf32>
    %41 = vector.multi_reduction <maximumf>, %40, %cst_21 [1] : vector<8x8xf32> to vector<8xf32>
    %42 = vector.shape_cast %41 : vector<8xf32> to vector<8x1xf32>
    %43 = vector.broadcast %42 : vector<8x1xf32> to vector<8x8xf32>
    %44 = arith.subf %40, %43 : vector<8x8xf32>
    %45 = math.exp %44 : vector<8x8xf32>
    %cst_22 = arith.constant dense<0.000000e+00> : vector<8xf32>
    %46 = vector.multi_reduction <add>, %45, %cst_22 [1] : vector<8x8xf32> to vector<8xf32>
    %47 = vector.shape_cast %46 : vector<8xf32> to vector<8x1xf32>
    %48 = vector.broadcast %47 : vector<8x1xf32> to vector<8x8xf32>
    %49 = arith.divf %45, %48 : vector<8x8xf32>
    %cst_23 = arith.constant dense<0.000000e+00> : vector<8x8xf32>
    %50 = tpu.matmul %49, %37, %cst_23 {dimension_numbers = #tpu.dot_dimension_numbers<[1], [0], [0], [1], [0, 0, 1, 1], [], []>} : vector<8x8xf32>, vector<8x8xf32>, vector<8x8xf32> -> vector<8x8xf32>
    %51 = vector.extract_strided_slice %34 {offsets = [0, 8], sizes = [8, 8], strides = [1, 1]} : vector<16x96xf32> to vector<8x8xf32>
    %52 = vector.extract_strided_slice %34 {offsets = [0, 40], sizes = [8, 8], strides = [1, 1]} : vector<16x96xf32> to vector<8x8xf32>
    %53 = vector.extract_strided_slice %34 {offsets = [0, 72], sizes = [8, 8], strides = [1, 1]} : vector<16x96xf32> to vector<8x8xf32>
    "tpu.trace_start"() <{level = 10 : i32, message = "qd,kd->qk"}> : () -> ()
    %cst_24 = arith.constant dense<0.000000e+00> : vector<8x8xf32>
    %54 = tpu.matmul %51, %52, %cst_24 {dimension_numbers = #tpu.dot_dimension_numbers<[1], [1], [0], [0], [0, 0, 1, 0], [], []>} : vector<8x8xf32>, vector<8x8xf32>, vector<8x8xf32> -> vector<8x8xf32>
    "tpu.trace_stop"() : () -> ()
    %cst_25 = arith.constant 0.353553385 : f32
    %55 = vector.broadcast %cst_25 : f32 to vector<8x8xf32>
    %56 = arith.mulf %54, %55 : vector<8x8xf32>
    %cst_26 = arith.constant dense<0xFF800000> : vector<8xf32>
    %57 = vector.multi_reduction <maximumf>, %56, %cst_26 [1] : vector<8x8xf32> to vector<8xf32>
    %58 = vector.shape_cast %57 : vector<8xf32> to vector<8x1xf32>
    %59 = vector.broadcast %58 : vector<8x1xf32> to vector<8x8xf32>
    %60 = arith.subf %56, %59 : vector<8x8xf32>
    %61 = math.exp %60 : vector<8x8xf32>
    %cst_27 = arith.constant dense<0.000000e+00> : vector<8xf32>
    %62 = vector.multi_reduction <add>, %61, %cst_27 [1] : vector<8x8xf32> to vector<8xf32>
    %63 = vector.shape_cast %62 : vector<8xf32> to vector<8x1xf32>
    %64 = vector.broadcast %63 : vector<8x1xf32> to vector<8x8xf32>
    %65 = arith.divf %61, %64 : vector<8x8xf32>
    %cst_28 = arith.constant dense<0.000000e+00> : vector<8x8xf32>
    %66 = tpu.matmul %65, %53, %cst_28 {dimension_numbers = #tpu.dot_dimension_numbers<[1], [0], [0], [1], [0, 0, 1, 1], [], []>} : vector<8x8xf32>, vector<8x8xf32>, vector<8x8xf32> -> vector<8x8xf32>
    %67 = vector.extract_strided_slice %34 {offsets = [0, 16], sizes = [8, 8], strides = [1, 1]} : vector<16x96xf32> to vector<8x8xf32>
    %68 = vector.extract_strided_slice %34 {offsets = [0, 48], sizes = [8, 8], strides = [1, 1]} : vector<16x96xf32> to vector<8x8xf32>
    %69 = vector.extract_strided_slice %34 {offsets = [0, 80], sizes = [8, 8], strides = [1, 1]} : vector<16x96xf32> to vector<8x8xf32>
    "tpu.trace_start"() <{level = 10 : i32, message = "qd,kd->qk"}> : () -> ()
    %cst_29 = arith.constant dense<0.000000e+00> : vector<8x8xf32>
    %70 = tpu.matmul %67, %68, %cst_29 {dimension_numbers = #tpu.dot_dimension_numbers<[1], [1], [0], [0], [0, 0, 1, 0], [], []>} : vector<8x8xf32>, vector<8x8xf32>, vector<8x8xf32> -> vector<8x8xf32>
    "tpu.trace_stop"() : () -> ()
    %cst_30 = arith.constant 0.353553385 : f32
    %71 = vector.broadcast %cst_30 : f32 to vector<8x8xf32>
    %72 = arith.mulf %70, %71 : vector<8x8xf32>
    %cst_31 = arith.constant dense<0xFF800000> : vector<8xf32>
    %73 = vector.multi_reduction <maximumf>, %72, %cst_31 [1] : vector<8x8xf32> to vector<8xf32>
    %74 = vector.shape_cast %73 : vector<8xf32> to vector<8x1xf32>
    %75 = vector.broadcast %74 : vector<8x1xf32> to vector<8x8xf32>
    %76 = arith.subf %72, %75 : vector<8x8xf32>
    %77 = math.exp %76 : vector<8x8xf32>
    %cst_32 = arith.constant dense<0.000000e+00> : vector<8xf32>
    %78 = vector.multi_reduction <add>, %77, %cst_32 [1] : vector<8x8xf32> to vector<8xf32>
    %79 = vector.shape_cast %78 : vector<8xf32> to vector<8x1xf32>
    %80 = vector.broadcast %79 : vector<8x1xf32> to vector<8x8xf32>
    %81 = arith.divf %77, %80 : vector<8x8xf32>
    %cst_33 = arith.constant dense<0.000000e+00> : vector<8x8xf32>
    %82 = tpu.matmul %81, %69, %cst_33 {dimension_numbers = #tpu.dot_dimension_numbers<[1], [0], [0], [1], [0, 0, 1, 1], [], []>} : vector<8x8xf32>, vector<8x8xf32>, vector<8x8xf32> -> vector<8x8xf32>
    %83 = vector.extract_strided_slice %34 {offsets = [0, 24], sizes = [8, 8], strides = [1, 1]} : vector<16x96xf32> to vector<8x8xf32>
    %84 = vector.extract_strided_slice %34 {offsets = [0, 56], sizes = [8, 8], strides = [1, 1]} : vector<16x96xf32> to vector<8x8xf32>
    %85 = vector.extract_strided_slice %34 {offsets = [0, 88], sizes = [8, 8], strides = [1, 1]} : vector<16x96xf32> to vector<8x8xf32>
    "tpu.trace_start"() <{level = 10 : i32, message = "qd,kd->qk"}> : () -> ()
    %cst_34 = arith.constant dense<0.000000e+00> : vector<8x8xf32>
    %86 = tpu.matmul %83, %84, %cst_34 {dimension_numbers = #tpu.dot_dimension_numbers<[1], [1], [0], [0], [0, 0, 1, 0], [], []>} : vector<8x8xf32>, vector<8x8xf32>, vector<8x8xf32> -> vector<8x8xf32>
    "tpu.trace_stop"() : () -> ()
    %cst_35 = arith.constant 0.353553385 : f32
    %87 = vector.broadcast %cst_35 : f32 to vector<8x8xf32>
    %88 = arith.mulf %86, %87 : vector<8x8xf32>
    %cst_36 = arith.constant dense<0xFF800000> : vector<8xf32>
    %89 = vector.multi_reduction <maximumf>, %88, %cst_36 [1] : vector<8x8xf32> to vector<8xf32>
    %90 = vector.shape_cast %89 : vector<8xf32> to vector<8x1xf32>
    %91 = vector.broadcast %90 : vector<8x1xf32> to vector<8x8xf32>
    %92 = arith.subf %88, %91 : vector<8x8xf32>
    %93 = math.exp %92 : vector<8x8xf32>
    %cst_37 = arith.constant dense<0.000000e+00> : vector<8xf32>
    %94 = vector.multi_reduction <add>, %93, %cst_37 [1] : vector<8x8xf32> to vector<8xf32>
    %95 = vector.shape_cast %94 : vector<8xf32> to vector<8x1xf32>
    %96 = vector.broadcast %95 : vector<8x1xf32> to vector<8x8xf32>
    %97 = arith.divf %93, %96 : vector<8x8xf32>
    %cst_38 = arith.constant dense<0.000000e+00> : vector<8x8xf32>
    %98 = tpu.matmul %97, %85, %cst_38 {dimension_numbers = #tpu.dot_dimension_numbers<[1], [0], [0], [1], [0, 0, 1, 1], [], []>} : vector<8x8xf32>, vector<8x8xf32>, vector<8x8xf32> -> vector<8x8xf32>
    %99 = tpu.concatenate %50, %66, %82, %98 in 1 : vector<8x8xf32>, vector<8x8xf32>, vector<8x8xf32>, vector<8x8xf32> -> vector<8x32xf32>
    %100 = vector.extract_strided_slice %34 {offsets = [8, 0], sizes = [8, 8], strides = [1, 1]} : vector<16x96xf32> to vector<8x8xf32>
    %101 = vector.extract_strided_slice %34 {offsets = [8, 32], sizes = [8, 8], strides = [1, 1]} : vector<16x96xf32> to vector<8x8xf32>
    %102 = vector.extract_strided_slice %34 {offsets = [8, 64], sizes = [8, 8], strides = [1, 1]} : vector<16x96xf32> to vector<8x8xf32>
    "tpu.trace_start"() <{level = 10 : i32, message = "qd,kd->qk"}> : () -> ()
    %cst_39 = arith.constant dense<0.000000e+00> : vector<8x8xf32>
    %103 = tpu.matmul %100, %101, %cst_39 {dimension_numbers = #tpu.dot_dimension_numbers<[1], [1], [0], [0], [0, 0, 1, 0], [], []>} : vector<8x8xf32>, vector<8x8xf32>, vector<8x8xf32> -> vector<8x8xf32>
    "tpu.trace_stop"() : () -> ()
    %cst_40 = arith.constant 0.353553385 : f32
    %104 = vector.broadcast %cst_40 : f32 to vector<8x8xf32>
    %105 = arith.mulf %103, %104 : vector<8x8xf32>
    %cst_41 = arith.constant dense<0xFF800000> : vector<8xf32>
    %106 = vector.multi_reduction <maximumf>, %105, %cst_41 [1] : vector<8x8xf32> to vector<8xf32>
    %107 = vector.shape_cast %106 : vector<8xf32> to vector<8x1xf32>
    %108 = vector.broadcast %107 : vector<8x1xf32> to vector<8x8xf32>
    %109 = arith.subf %105, %108 : vector<8x8xf32>
    %110 = math.exp %109 : vector<8x8xf32>
    %cst_42 = arith.constant dense<0.000000e+00> : vector<8xf32>
    %111 = vector.multi_reduction <add>, %110, %cst_42 [1] : vector<8x8xf32> to vector<8xf32>
    %112 = vector.shape_cast %111 : vector<8xf32> to vector<8x1xf32>
    %113 = vector.broadcast %112 : vector<8x1xf32> to vector<8x8xf32>
    %114 = arith.divf %110, %113 : vector<8x8xf32>
    %cst_43 = arith.constant dense<0.000000e+00> : vector<8x8xf32>
    %115 = tpu.matmul %114, %102, %cst_43 {dimension_numbers = #tpu.dot_dimension_numbers<[1], [0], [0], [1], [0, 0, 1, 1], [], []>} : vector<8x8xf32>, vector<8x8xf32>, vector<8x8xf32> -> vector<8x8xf32>
    %116 = vector.extract_strided_slice %34 {offsets = [8, 8], sizes = [8, 8], strides = [1, 1]} : vector<16x96xf32> to vector<8x8xf32>
    %117 = vector.extract_strided_slice %34 {offsets = [8, 40], sizes = [8, 8], strides = [1, 1]} : vector<16x96xf32> to vector<8x8xf32>
    %118 = vector.extract_strided_slice %34 {offsets = [8, 72], sizes = [8, 8], strides = [1, 1]} : vector<16x96xf32> to vector<8x8xf32>
    "tpu.trace_start"() <{level = 10 : i32, message = "qd,kd->qk"}> : () -> ()
    %cst_44 = arith.constant dense<0.000000e+00> : vector<8x8xf32>
    %119 = tpu.matmul %116, %117, %cst_44 {dimension_numbers = #tpu.dot_dimension_numbers<[1], [1], [0], [0], [0, 0, 1, 0], [], []>} : vector<8x8xf32>, vector<8x8xf32>, vector<8x8xf32> -> vector<8x8xf32>
    "tpu.trace_stop"() : () -> ()
    %cst_45 = arith.constant 0.353553385 : f32
    %120 = vector.broadcast %cst_45 : f32 to vector<8x8xf32>
    %121 = arith.mulf %119, %120 : vector<8x8xf32>
    %cst_46 = arith.constant dense<0xFF800000> : vector<8xf32>
    %122 = vector.multi_reduction <maximumf>, %121, %cst_46 [1] : vector<8x8xf32> to vector<8xf32>
    %123 = vector.shape_cast %122 : vector<8xf32> to vector<8x1xf32>
    %124 = vector.broadcast %123 : vector<8x1xf32> to vector<8x8xf32>
    %125 = arith.subf %121, %124 : vector<8x8xf32>
    %126 = math.exp %125 : vector<8x8xf32>
    %cst_47 = arith.constant dense<0.000000e+00> : vector<8xf32>
    %127 = vector.multi_reduction <add>, %126, %cst_47 [1] : vector<8x8xf32> to vector<8xf32>
    %128 = vector.shape_cast %127 : vector<8xf32> to vector<8x1xf32>
    %129 = vector.broadcast %128 : vector<8x1xf32> to vector<8x8xf32>
    %130 = arith.divf %126, %129 : vector<8x8xf32>
    %cst_48 = arith.constant dense<0.000000e+00> : vector<8x8xf32>
    %131 = tpu.matmul %130, %118, %cst_48 {dimension_numbers = #tpu.dot_dimension_numbers<[1], [0], [0], [1], [0, 0, 1, 1], [], []>} : vector<8x8xf32>, vector<8x8xf32>, vector<8x8xf32> -> vector<8x8xf32>
    %132 = vector.extract_strided_slice %34 {offsets = [8, 16], sizes = [8, 8], strides = [1, 1]} : vector<16x96xf32> to vector<8x8xf32>
    %133 = vector.extract_strided_slice %34 {offsets = [8, 48], sizes = [8, 8], strides = [1, 1]} : vector<16x96xf32> to vector<8x8xf32>
    %134 = vector.extract_strided_slice %34 {offsets = [8, 80], sizes = [8, 8], strides = [1, 1]} : vector<16x96xf32> to vector<8x8xf32>
    "tpu.trace_start"() <{level = 10 : i32, message = "qd,kd->qk"}> : () -> ()
    %cst_49 = arith.constant dense<0.000000e+00> : vector<8x8xf32>
    %135 = tpu.matmul %132, %133, %cst_49 {dimension_numbers = #tpu.dot_dimension_numbers<[1], [1], [0], [0], [0, 0, 1, 0], [], []>} : vector<8x8xf32>, vector<8x8xf32>, vector<8x8xf32> -> vector<8x8xf32>
    "tpu.trace_stop"() : () -> ()
    %cst_50 = arith.constant 0.353553385 : f32
    %136 = vector.broadcast %cst_50 : f32 to vector<8x8xf32>
    %137 = arith.mulf %135, %136 : vector<8x8xf32>
    %cst_51 = arith.constant dense<0xFF800000> : vector<8xf32>
    %138 = vector.multi_reduction <maximumf>, %137, %cst_51 [1] : vector<8x8xf32> to vector<8xf32>
    %139 = vector.shape_cast %138 : vector<8xf32> to vector<8x1xf32>
    %140 = vector.broadcast %139 : vector<8x1xf32> to vector<8x8xf32>
    %141 = arith.subf %137, %140 : vector<8x8xf32>
    %142 = math.exp %141 : vector<8x8xf32>
    %cst_52 = arith.constant dense<0.000000e+00> : vector<8xf32>
    %143 = vector.multi_reduction <add>, %142, %cst_52 [1] : vector<8x8xf32> to vector<8xf32>
    %144 = vector.shape_cast %143 : vector<8xf32> to vector<8x1xf32>
    %145 = vector.broadcast %144 : vector<8x1xf32> to vector<8x8xf32>
    %146 = arith.divf %142, %145 : vector<8x8xf32>
    %cst_53 = arith.constant dense<0.000000e+00> : vector<8x8xf32>
    %147 = tpu.matmul %146, %134, %cst_53 {dimension_numbers = #tpu.dot_dimension_numbers<[1], [0], [0], [1], [0, 0, 1, 1], [], []>} : vector<8x8xf32>, vector<8x8xf32>, vector<8x8xf32> -> vector<8x8xf32>
    %148 = vector.extract_strided_slice %34 {offsets = [8, 24], sizes = [8, 8], strides = [1, 1]} : vector<16x96xf32> to vector<8x8xf32>
    %149 = vector.extract_strided_slice %34 {offsets = [8, 56], sizes = [8, 8], strides = [1, 1]} : vector<16x96xf32> to vector<8x8xf32>
    %150 = vector.extract_strided_slice %34 {offsets = [8, 88], sizes = [8, 8], strides = [1, 1]} : vector<16x96xf32> to vector<8x8xf32>
    "tpu.trace_start"() <{level = 10 : i32, message = "qd,kd->qk"}> : () -> ()
    %cst_54 = arith.constant dense<0.000000e+00> : vector<8x8xf32>
    %151 = tpu.matmul %148, %149, %cst_54 {dimension_numbers = #tpu.dot_dimension_numbers<[1], [1], [0], [0], [0, 0, 1, 0], [], []>} : vector<8x8xf32>, vector<8x8xf32>, vector<8x8xf32> -> vector<8x8xf32>
    "tpu.trace_stop"() : () -> ()
    %cst_55 = arith.constant 0.353553385 : f32
    %152 = vector.broadcast %cst_55 : f32 to vector<8x8xf32>
    %153 = arith.mulf %151, %152 : vector<8x8xf32>
    %cst_56 = arith.constant dense<0xFF800000> : vector<8xf32>
    %154 = vector.multi_reduction <maximumf>, %153, %cst_56 [1] : vector<8x8xf32> to vector<8xf32>
    %155 = vector.shape_cast %154 : vector<8xf32> to vector<8x1xf32>
    %156 = vector.broadcast %155 : vector<8x1xf32> to vector<8x8xf32>
    %157 = arith.subf %153, %156 : vector<8x8xf32>
    %158 = math.exp %157 : vector<8x8xf32>
    %cst_57 = arith.constant dense<0.000000e+00> : vector<8xf32>
    %159 = vector.multi_reduction <add>, %158, %cst_57 [1] : vector<8x8xf32> to vector<8xf32>
    %160 = vector.shape_cast %159 : vector<8xf32> to vector<8x1xf32>
    %161 = vector.broadcast %160 : vector<8x1xf32> to vector<8x8xf32>
    %162 = arith.divf %158, %161 : vector<8x8xf32>
    %cst_58 = arith.constant dense<0.000000e+00> : vector<8x8xf32>
    %163 = tpu.matmul %162, %150, %cst_58 {dimension_numbers = #tpu.dot_dimension_numbers<[1], [0], [0], [1], [0, 0, 1, 1], [], []>} : vector<8x8xf32>, vector<8x8xf32>, vector<8x8xf32> -> vector<8x8xf32>
    %164 = tpu.concatenate %115, %131, %147, %163 in 1 : vector<8x8xf32>, vector<8x8xf32>, vector<8x8xf32>, vector<8x8xf32> -> vector<8x32xf32>
    %165 = tpu.concatenate %99, %164 in 0 : vector<8x32xf32>, vector<8x32xf32> -> vector<16x32xf32>
    %c0_59 = arith.constant 0 : index
    %c0_60 = arith.constant 0 : index
    %c0_61 = arith.constant 0 : index
    %166 = vector.load %arg7[%c0_59, %c0_60, %c0_61] : memref<1x32x32xf32, #tpu.memory_space<vmem>>, vector<1x32x32xf32>
    %167 = vector.shape_cast %166 : vector<1x32x32xf32> to vector<32x32xf32>
    %cst_62 = arith.constant dense<0.000000e+00> : vector<16x32xf32>
    %168 = tpu.matmul %165, %167, %cst_62 {dimension_numbers = #tpu.dot_dimension_numbers<[1], [0], [0], [1], [0, 0, 1, 1], [], []>} : vector<16x32xf32>, vector<32x32xf32>, vector<16x32xf32> -> vector<16x32xf32>
    %c0_63 = arith.constant 0 : index
    %c0_64 = arith.constant 0 : index
    %c0_65 = arith.constant 0 : index
    %169 = vector.load %arg8[%c0_63, %c0_64, %c0_65] : memref<1x1x32xf32, #tpu.memory_space<vmem>>, vector<1x1x32xf32>
    %170 = vector.shape_cast %169 : vector<1x1x32xf32> to vector<1x32xf32>
    %171 = vector.broadcast %170 : vector<1x32xf32> to vector<16x32xf32>
    %172 = arith.addf %168, %171 : vector<16x32xf32>
    %173 = arith.addf %27, %172 : vector<16x32xf32>
    %c0_66 = arith.constant 0 : index
    %c0_67 = arith.constant 0 : index
    %c0_68 = arith.constant 0 : index
    %174 = vector.load %arg9[%c0_66, %c0_67, %c0_68] : memref<1x1x32xf32, #tpu.memory_space<vmem>>, vector<1x1x32xf32>
    %175 = vector.shape_cast %174 : vector<1x1x32xf32> to vector<1x32xf32>
    %c0_69 = arith.constant 0 : index
    %c0_70 = arith.constant 0 : index
    %c0_71 = arith.constant 0 : index
    %176 = vector.load %arg10[%c0_69, %c0_70, %c0_71] : memref<1x1x32xf32, #tpu.memory_space<vmem>>, vector<1x1x32xf32>
    %177 = vector.shape_cast %176 : vector<1x1x32xf32> to vector<1x32xf32>
    %cst_72 = arith.constant dense<0.000000e+00> : vector<16xf32>
    %178 = vector.multi_reduction <add>, %173, %cst_72 [1] : vector<16x32xf32> to vector<16xf32>
    %179 = vector.shape_cast %178 : vector<16xf32> to vector<16x1xf32>
    %cst_73 = arith.constant 3.200000e+01 : f32
    %180 = vector.broadcast %cst_73 : f32 to vector<16x1xf32>
    %181 = arith.divf %179, %180 : vector<16x1xf32>
    %182 = vector.broadcast %181 : vector<16x1xf32> to vector<16x32xf32>
    %183 = arith.subf %173, %182 : vector<16x32xf32>
    %184 = arith.mulf %183, %183 : vector<16x32xf32>
    %cst_74 = arith.constant dense<0.000000e+00> : vector<16xf32>
    %185 = vector.multi_reduction <add>, %184, %cst_74 [1] : vector<16x32xf32> to vector<16xf32>
    %186 = vector.shape_cast %185 : vector<16xf32> to vector<16x1xf32>
    %cst_75 = arith.constant 3.200000e+01 : f32
    %187 = vector.broadcast %cst_75 : f32 to vector<16x1xf32>
    %188 = arith.divf %186, %187 : vector<16x1xf32>
    %cst_76 = arith.constant 9.99999974E-6 : f32
    %189 = vector.broadcast %cst_76 : f32 to vector<16x1xf32>
    %190 = arith.addf %188, %189 : vector<16x1xf32>
    %191 = math.rsqrt %190 : vector<16x1xf32>
    %192 = vector.broadcast %191 : vector<16x1xf32> to vector<16x32xf32>
    %193 = arith.mulf %183, %192 : vector<16x32xf32>
    %194 = vector.broadcast %175 : vector<1x32xf32> to vector<16x32xf32>
    %195 = arith.mulf %193, %194 : vector<16x32xf32>
    %196 = vector.broadcast %177 : vector<1x32xf32> to vector<16x32xf32>
    %197 = arith.addf %195, %196 : vector<16x32xf32>
    %c0_77 = arith.constant 0 : index
    %c0_78 = arith.constant 0 : index
    %c0_79 = arith.constant 0 : index
    %198 = vector.load %arg11[%c0_77, %c0_78, %c0_79] : memref<1x32x128xf32, #tpu.memory_space<vmem>>, vector<1x32x128xf32>
    %199 = vector.shape_cast %198 : vector<1x32x128xf32> to vector<32x128xf32>
    %cst_80 = arith.constant dense<0.000000e+00> : vector<16x128xf32>
    %200 = tpu.matmul %197, %199, %cst_80 {dimension_numbers = #tpu.dot_dimension_numbers<[1], [0], [0], [1], [0, 0, 1, 1], [], []>} : vector<16x32xf32>, vector<32x128xf32>, vector<16x128xf32> -> vector<16x128xf32>
    %c0_81 = arith.constant 0 : index
    %c0_82 = arith.constant 0 : index
    %c0_83 = arith.constant 0 : index
    %201 = vector.load %arg12[%c0_81, %c0_82, %c0_83] : memref<1x1x128xf32, #tpu.memory_space<vmem>>, vector<1x1x128xf32>
    %202 = vector.shape_cast %201 : vector<1x1x128xf32> to vector<1x128xf32>
    %203 = vector.broadcast %202 : vector<1x128xf32> to vector<16x128xf32>
    %204 = arith.addf %200, %203 : vector<16x128xf32>
    %cst_84 = arith.constant 0.000000e+00 : f32
    %205 = vector.broadcast %cst_84 : f32 to vector<16x128xf32>
    %206 = arith.maximumf %204, %205 : vector<16x128xf32>
    %c0_85 = arith.constant 0 : index
    %c0_86 = arith.constant 0 : index
    %c0_87 = arith.constant 0 : index
    %207 = vector.load %arg13[%c0_85, %c0_86, %c0_87] : memref<1x128x32xf32, #tpu.memory_space<vmem>>, vector<1x128x32xf32>
    %208 = vector.shape_cast %207 : vector<1x128x32xf32> to vector<128x32xf32>
    %cst_88 = arith.constant dense<0.000000e+00> : vector<16x32xf32>
    %209 = tpu.matmul %206, %208, %cst_88 {dimension_numbers = #tpu.dot_dimension_numbers<[1], [0], [0], [1], [0, 0, 1, 1], [], []>} : vector<16x128xf32>, vector<128x32xf32>, vector<16x32xf32> -> vector<16x32xf32>
    %c0_89 = arith.constant 0 : index
    %c0_90 = arith.constant 0 : index
    %c0_91 = arith.constant 0 : index
    %210 = vector.load %arg14[%c0_89, %c0_90, %c0_91] : memref<1x1x32xf32, #tpu.memory_space<vmem>>, vector<1x1x32xf32>
    %211 = vector.shape_cast %210 : vector<1x1x32xf32> to vector<1x32xf32>
    %212 = vector.broadcast %211 : vector<1x32xf32> to vector<16x32xf32>
    %213 = arith.addf %209, %212 : vector<16x32xf32>
    %214 = arith.addf %173, %213 : vector<16x32xf32>
    %c0_92 = arith.constant 0 : index
    %c0_93 = arith.constant 0 : index
    %215 = vector.load %arg18[%c0_92, %c0_93] : memref<16x32xf32, #tpu.memory_space<vmem>>, vector<16x32xf32>
    tpu.vector_store %arg18[%c0_92, %c0_93], %214 {strides = array<i32>} : memref<16x32xf32, #tpu.memory_space<vmem>>, vector<16x32xf32>,
    %c1_i32 = arith.constant 1 : i32
    %216 = arith.cmpi eq, %arg1, %c1_i32 : i32
    %217 = arith.extui %216 : i1 to i32
    %c0_i32_94 = arith.constant 0 : i32
    %218 = arith.cmpi ne, %217, %c0_i32_94 : i32
    scf.if %218 {
      %c0_95 = arith.constant 0 : index
      %c0_96 = arith.constant 0 : index
      %219 = vector.load %arg15[%c0_95, %c0_96] : memref<1x32xf32, #tpu.memory_space<vmem>>, vector<1x32xf32>
      %c0_97 = arith.constant 0 : index
      %c0_98 = arith.constant 0 : index
      %220 = vector.load %arg16[%c0_97, %c0_98] : memref<1x32xf32, #tpu.memory_space<vmem>>, vector<1x32xf32>
      %cst_99 = arith.constant dense<0.000000e+00> : vector<16xf32>
      %221 = vector.multi_reduction <add>, %214, %cst_99 [1] : vector<16x32xf32> to vector<16xf32>
      %222 = vector.shape_cast %221 : vector<16xf32> to vector<16x1xf32>
      %cst_100 = arith.constant 3.200000e+01 : f32
      %223 = vector.broadcast %cst_100 : f32 to vector<16x1xf32>
      %224 = arith.divf %222, %223 : vector<16x1xf32>
      %225 = vector.broadcast %224 : vector<16x1xf32> to vector<16x32xf32>
      %226 = arith.subf %214, %225 : vector<16x32xf32>
      %227 = arith.mulf %226, %226 : vector<16x32xf32>
      %cst_101 = arith.constant dense<0.000000e+00> : vector<16xf32>
      %228 = vector.multi_reduction <add>, %227, %cst_101 [1] : vector<16x32xf32> to vector<16xf32>
      %229 = vector.shape_cast %228 : vector<16xf32> to vector<16x1xf32>
      %cst_102 = arith.constant 3.200000e+01 : f32
      %230 = vector.broadcast %cst_102 : f32 to vector<16x1xf32>
      %231 = arith.divf %229, %230 : vector<16x1xf32>
      %cst_103 = arith.constant 9.99999974E-6 : f32
      %232 = vector.broadcast %cst_103 : f32 to vector<16x1xf32>
      %233 = arith.addf %231, %232 : vector<16x1xf32>
      %234 = math.rsqrt %233 : vector<16x1xf32>
      %235 = vector.broadcast %234 : vector<16x1xf32> to vector<16x32xf32>
      %236 = arith.mulf %226, %235 : vector<16x32xf32>
      %237 = vector.broadcast %219 : vector<1x32xf32> to vector<16x32xf32>
      %238 = arith.mulf %236, %237 : vector<16x32xf32>
      %239 = vector.broadcast %220 : vector<1x32xf32> to vector<16x32xf32>
      %240 = arith.addf %238, %239 : vector<16x32xf32>
      %241 = vector.shape_cast %240 : vector<16x32xf32> to vector<2x8x32xf32>
      %c0_104 = arith.constant 0 : index
      %c0_105 = arith.constant 0 : index
      %c0_106 = arith.constant 0 : index
      %242 = vector.load %arg17[%c0_104, %c0_105, %c0_106] : memref<2x8x32xf32, #tpu.memory_space<vmem>>, vector<2x8x32xf32>
      tpu.vector_store %arg17[%c0_104, %c0_105, %c0_106], %241 {strides = array<i32>} : memref<2x8x32xf32, #tpu.memory_space<vmem>>, vector<2x8x32xf32>,
    } else {
    }
    return
  }
  func.func @transform_0(%arg0: i32, %arg1: i32) -> (i32, i32, i32) {
    %c0_i32 = arith.constant 0 : i32
    %c0_i32_0 = arith.constant 0 : i32
    %c0_i32_1 = arith.constant 0 : i32
    return %arg0, %c0_i32, %c0_i32_0 : i32, i32, i32
  }
  func.func @transform_1(%arg0: i32, %arg1: i32) -> (i32, i32, i32) {
    %c0_i32 = arith.constant 0 : i32
    %c0_i32_0 = arith.constant 0 : i32
    %c0_i32_1 = arith.constant 0 : i32
    return %arg1, %c0_i32, %c0_i32_0 : i32, i32, i32
  }
  func.func @transform_2(%arg0: i32, %arg1: i32) -> (i32, i32, i32) {
    %c0_i32 = arith.constant 0 : i32
    %c0_i32_0 = arith.constant 0 : i32
    %c0_i32_1 = arith.constant 0 : i32
    return %arg1, %c0_i32, %c0_i32_0 : i32, i32, i32
  }
  func.func @transform_3(%arg0: i32, %arg1: i32) -> (i32, i32, i32) {
    %c0_i32 = arith.constant 0 : i32
    %c0_i32_0 = arith.constant 0 : i32
    %c0_i32_1 = arith.constant 0 : i32
    return %arg1, %c0_i32, %c0_i32_0 : i32, i32, i32
  }
  func.func @transform_4(%arg0: i32, %arg1: i32) -> (i32, i32, i32) {
    %c0_i32 = arith.constant 0 : i32
    %c0_i32_0 = arith.constant 0 : i32
    %c0_i32_1 = arith.constant 0 : i32
    return %arg1, %c0_i32, %c0_i32_0 : i32, i32, i32
  }
  func.func @transform_5(%arg0: i32, %arg1: i32) -> (i32, i32, i32) {
    %c0_i32 = arith.constant 0 : i32
    %c0_i32_0 = arith.constant 0 : i32
    %c0_i32_1 = arith.constant 0 : i32
    return %arg1, %c0_i32, %c0_i32_0 : i32, i32, i32
  }
  func.func @transform_6(%arg0: i32, %arg1: i32) -> (i32, i32, i32) {
    %c0_i32 = arith.constant 0 : i32
    %c0_i32_0 = arith.constant 0 : i32
    %c0_i32_1 = arith.constant 0 : i32
    return %arg1, %c0_i32, %c0_i32_0 : i32, i32, i32
  }
  func.func @transform_7(%arg0: i32, %arg1: i32) -> (i32, i32, i32) {
    %c0_i32 = arith.constant 0 : i32
    %c0_i32_0 = arith.constant 0 : i32
    %c0_i32_1 = arith.constant 0 : i32
    return %arg1, %c0_i32, %c0_i32_0 : i32, i32, i32
  }
  func.func @transform_8(%arg0: i32, %arg1: i32) -> (i32, i32, i32) {
    %c0_i32 = arith.constant 0 : i32
    %c0_i32_0 = arith.constant 0 : i32
    %c0_i32_1 = arith.constant 0 : i32
    return %arg1, %c0_i32, %c0_i32_0 : i32, i32, i32
  }
  func.func @transform_9(%arg0: i32, %arg1: i32) -> (i32, i32, i32) {
    %c0_i32 = arith.constant 0 : i32
    %c0_i32_0 = arith.constant 0 : i32
    %c0_i32_1 = arith.constant 0 : i32
    return %arg1, %c0_i32, %c0_i32_0 : i32, i32, i32
  }
  func.func @transform_10(%arg0: i32, %arg1: i32) -> (i32, i32, i32) {
    %c0_i32 = arith.constant 0 : i32
    %c0_i32_0 = arith.constant 0 : i32
    %c0_i32_1 = arith.constant 0 : i32
    return %arg1, %c0_i32, %c0_i32_0 : i32, i32, i32
  }
  func.func @transform_11(%arg0: i32, %arg1: i32) -> (i32, i32, i32) {
    %c0_i32 = arith.constant 0 : i32
    %c0_i32_0 = arith.constant 0 : i32
    %c0_i32_1 = arith.constant 0 : i32
    return %arg1, %c0_i32, %c0_i32_0 : i32, i32, i32
  }
  func.func @transform_12(%arg0: i32, %arg1: i32) -> (i32, i32, i32) {
    %c0_i32 = arith.constant 0 : i32
    %c0_i32_0 = arith.constant 0 : i32
    %c0_i32_1 = arith.constant 0 : i32
    return %arg1, %c0_i32, %c0_i32_0 : i32, i32, i32
  }
  func.func @transform_13(%arg0: i32, %arg1: i32) -> (i32, i32) {
    %c0_i32 = arith.constant 0 : i32
    %c0_i32_0 = arith.constant 0 : i32
    %c0_i32_1 = arith.constant 0 : i32
    return %c0_i32, %c0_i32_0 : i32, i32
  }
  func.func @transform_14(%arg0: i32, %arg1: i32) -> (i32, i32) {
    %c0_i32 = arith.constant 0 : i32
    %c0_i32_0 = arith.constant 0 : i32
    %c0_i32_1 = arith.constant 0 : i32
    return %c0_i32, %c0_i32_0 : i32, i32
  }
  func.func @transform_15(%arg0: i32, %arg1: i32) -> (i32, i32, i32) {
    %c0_i32 = arith.constant 0 : i32
    %c0_i32_0 = arith.constant 0 : i32
    %c0_i32_1 = arith.constant 0 : i32
    return %arg0, %c0_i32, %c0_i32_0 : i32, i32, i32
  }
}

</mosaic_0001>

<bundles_post_ra>
// kernel: tpu_custom_call.1
= control target key start
LH: loop header
LB: loop body
LE: loop exit
PB: predicated region body
PF: predicated region fallthrough
CT: control target
= control target key end

     0   :  { %s3677_s0 = inlined_call_operand.vmem [shape: f32[2,8,32], index: 0, kind: input, shape index: {}]   ;;  %s3678_s1 = inlined_call_operand.vmem [shape: f32[2,1,32], index: 1, kind: input, shape index: {}]   ;;  %s3679_s2 = inlined_call_operand.vmem [shape: f32[2,1,32], index: 2, kind: input, shape index: {}]   ;;  %s3680_s3 = inlined_call_operand.vmem [shape: f32[2,32,96], index: 3, kind: input, shape index: {}]   ;;  %s3681_s4 = inlined_call_operand.vmem [shape: f32[2,1,96], index: 4, kind: input, shape index: {}]   ;;  %s3682_s5 = inlined_call_operand.vmem [shape: f32[2,32,32], index: 5, kind: input, shape index: {}]   ;;  %s3683_s6 = inlined_call_operand.vmem [shape: f32[2,1,32], index: 6, kind: input, shape index: {}]   ;;  %s3684_s7 = inlined_call_operand.vmem [shape: f32[2,1,32], index: 7, kind: input, shape index: {}]   ;;  %s3685_s8 = inlined_call_operand.vmem [shape: f32[2,1,32], index: 8, kind: input, shape index: {}]   ;;  %s3686_s9 = inlined_call_operand.vmem [shape: f32[2,32,128], index: 9, kind: input, shape index: {}]   ;;  %s3687_s10 = inlined_call_operand.vmem [shape: f32[2,1,128], index: 10, kind: input, shape index: {}]   ;;  %s3688_s11 = inlined_call_operand.vmem [shape: f32[2,128,32], index: 11, kind: input, shape index: {}]   ;;  %s3689_s12 = inlined_call_operand.vmem [shape: f32[2,1,32], index: 12, kind: input, shape index: {}]   ;;  %s3690_s13 = inlined_call_operand.vmem [shape: f32[1,32], index: 13, kind: input, shape index: {}]   ;;  %s3691_s14 = inlined_call_operand.vmem [shape: f32[1,32], index: 14, kind: input, shape index: {}]   ;;  %s3692_s15 = inlined_call_operand.hbm [shape: f32[2,8,32], index: 15, kind: output, shape index: {}]  }
   0x1   :  { %3696 = sst [smem:[#allocation10_spill]] %s3680_s3 }
   0x2   :  { %3697 = sst [smem:[#allocation11_spill]] %s3682_s5 }
   0x3   :  { %3698 = sst [smem:[#allocation12_spill]] %s3690_s13 }
   0x4   :  { %3699 = sst [smem:[#allocation13_spill]] %s3691_s14 }
   0x5   :  { %3700 = sst [smem:[#allocation14_spill]] %s3692_s15 }
   0x6   :  { %20 = vsyncpa [#allocation4], 0  ;;  %s3291_s18 = smov 0   ;;  %s3293_s19 = smov 0  }
   0x7   :  { %s3295_s20 = smov 0  }
   0x8 LB: > { %3701 = sst [smem:[#allocation6_spill]] %s3187_s19  ;;  %s35_s22 = sadd.s32 1, %s3187_s19  ;;  %s3191_s20 = sphi %s3295_s20, %s26_s20   ;;  %s3187_s19 = sphi %s3293_s19, %s3720_s19   ;;  %s3183_s18 = sphi %s3291_s18, %s3719_s18  }
   0x9   : > { %3702 = sst [smem:[#allocation7_spill]] %s3191_s20  ;;  %p36_p0 = scmp.ge.s32.totalorder %s35_s22, 2 }
   0xa   : > { %p2774_p1 = scmp.ge.s32.totalorder %s3191_s20, 1  ;;  %p555_p2 = scmp.lt.s32.totalorder %s3191_s20, 3 }
   0xb   : > { %s3722_s22 = smov (%p36_p0, %s35_s22), 0 }
   0xc   : > { %3703 = sst [smem:[#allocation8_spill]] %s3722_s22  ;;  %p556_p3 = pnand %p2774_p1, %p555_p2 }
   0xe   : > { %559 = sbr.rel (%p556_p3) target bundleno = 2807 (0xaf7), region = 80 }
  0x13   : > { %p648_p4 = scmp.lt.s32.totalorder %s3183_s18, 1  ;;  %s3704_s3 = sld [smem:[#allocation10_spill]] }
  0x14   : > { %s3705_s5 = sld [smem:[#allocation11_spill]]  ;;  %p2783_p5 = scmp.ne.s32.totalorder %s3183_s18, 0 }
  0x15   : > { %s3314_s23 = scalar_select %p648_p4, %s3183_s18, 1 }
  0x17   : > { %s2829_s30 = sshll.u32 %s3314_s23, 5  ;;  %s672_s13 = scalar_lea.vmem %s3684_s7, %s3314_s23 }
  0x18   : > { %s675_s21 = scalar_lea.vmem %s3685_s8, %s3314_s23  ;;  %s691_s16 = scalar_lea.vmem %s3689_s12, %s3314_s23 }
  0x19   : > { %s3332_s22 = scalar_lea.vmem %s3704_s3, %s2829_s30  ;;  %s3354_s3 = scalar_lea.vmem %s3686_s9, %s2829_s30 }
  0x1a   : > { %s3337_s20 = scalar_lea.vmem %s3705_s5, %s2829_s30  ;;  %s683_s5 = scalar_lea.vmem %s3687_s10, %s3314_s23 }
  0x1b   : > { %3706 = sst [smem:[#allocation9_spill]] %s3337_s20  ;;  %s2832_s20 = sshll.u32 %s3314_s23, 7 }
  0x1c   : > { %s3364_s27 = scalar_lea.vmem %s3688_s11, %s2832_s20  ;;  %696 = sbr.rel (%p2783_p5) target bundleno = 35 (0x23), region = 84 }
  0x21   : > { %v697_v0 = vld [vmem:[%s3677_s0] sm:$0xff]  ;;  %vm699_vm0 = vcmask 261120   ;;  %v698_v1 = vld [vmem:[%s3677_s0 + $0x8] sm:$0xff] }
  0x22   : > { %700 = vst.msk [vmem:[#allocation2] sm:$0xff] %vm699_vm0, %v697_v0  ;;  %701 = vst.msk [vmem:[#allocation2 + $0x8] sm:$0xff] %vm699_vm0, %v698_v1 }
  0x23 PF: > { %vm706_vm1 = vcmask 261120   ;;  %v753_v16 = vld [vmem:[%s3332_s22 + $0x18] sm:$0xff]  ;;  %v752_v17 = vld [vmem:[%s3332_s22 + $0x10] sm:$0xff]  ;;  %v751_v18 = vld [vmem:[%s3332_s22 + $0x8] sm:$0xff]  ;;  %s3707_s19 = scalar_lea.vmem %s3678_s1, %s3314_s23  ;;  %v3193_v36 = vmov 0.0   ;;  %vm3194_vm2 = vmmov 0   ;;  %s3709_s17 = scalar_lea.vmem %s3681_s4, %s3314_s23 }
  0x24   : > { %2901 = vmatprep.subr.mxu1 %v753_v16  ;;  %v750_v19 = vld [vmem:[%s3332_s22] sm:$0xff]  ;;  %s3708_s22 = scalar_lea.vmem %s3679_s2, %s3314_s23  ;;  %2922 = vmatprep.subr.mxu0 %v3193_v36  ;;  %s3195_s30 = smov 88   ;;  %vm845_vm3 = vcmask 64512   ;;  %vm1519_vm4 = vcmask 130048   ;;  %vm1521_vm5 = vcmask 195584  }
  0x25   : > { %2902 = vmatpush3.msra.mxu1 %v753_v16  ;;  %v2784_v27 = vld [vmem:[%s3707_s19] ss:$0 sm:$0xff]  ;;  %2924 = vmatprep.mubr.msk.f32.mxu0 %vm3194_vm2, %v3193_v36  ;;  %s3196_s24 = smov 96   ;;  %s3197_s25 = smov 120  }
  0x26   : > { %2903 = vmatprep.subr.mxu1 %v752_v17  ;;  %v2785_v29 = vld [vmem:[%s3708_s22] ss:$0 sm:$0xff]  ;;  %s3198_s20 = smov 112   ;;  %s3199_s15 = smov 80  }
  0x27   : > { %2904 = vmatpush3.msra.mxu1 %v752_v17  ;;  %v2786_v38 = vld [vmem:[%s3709_s17] ss:$0 sm:$0xff]  ;;  %s3200_s19 = smov 104   ;;  %s3201_s14 = smov 72  }
  0x28   : > { %2905 = vmatprep.subr.mxu1 %v751_v18  ;;  %s3202_s26 = smov 64   ;;  %s3203_s22 = smov 48  }
  0x29   : > { %v702_v2 = vld [vmem:[#allocation2] sm:$0xff]  ;;  %v703_v3 = vld [vmem:[#allocation2 + $0x8] sm:$0xff]  ;;  %2906 = vmatpush3.msra.mxu1 %v751_v18  ;;  %s3204_s29 = smov 40   ;;  %s3205_s28 = smov 56  }
  0x2a   : > { %v707_v4 = vsel %vm706_vm1, %v702_v2, 0.0  ;;  %v710_v5 = vsel %vm706_vm1, %v703_v3, 0.0  ;;  %2907 = vmatprep.subr.mxu1 %v750_v19  ;;  %s3710_s17 = sld [smem:[#allocation9_spill]]  ;;  %p2822_p6 = scmp.ne.s32.totalorder %s3183_s18, 1 }
  0x2b   : > { %708 = vadd.xlane.f32.xlu0 %v707_v4  ;;  %2908 = vmatpush3.msra.mxu1 %v750_v19 }
  0x2c   : > { %2912 = vmatprep.subr.mxu1 %v3193_v36 }
  0x2f   : > { %711 = vadd.xlane.f32.xlu0 %v710_v5 }
  0xb4   : > { %v709_v6 = vpop.xlane.xlu0 %708 }
  0xb5   : > { %v714_v7 = vmul.f32 0.03125, %v709_v6 }
  0xb7   : > { %v716_v8 = vsub.f32 %v702_v2, %v714_v7 }
  0xb8   : > { %v712_v9 = vpop.xlane.xlu0 %711 }
  0xb9   : > { %v715_v10 = vmul.f32 0.03125, %v712_v9  ;;  %v718_v11 = vmul.f32 %v716_v8, %v716_v8 }
  0xbb   : > { %v717_v12 = vsub.f32 %v703_v3, %v715_v10  ;;  %v720_v13 = vsel %vm706_vm1, %v718_v11, 0.0 }
  0xbc   : > { %721 = vadd.xlane.f32.xlu1 %v720_v13 }
  0xbd   : > { %v719_v14 = vmul.f32 %v717_v12, %v717_v12 }
  0xbf   : > { %v723_v15 = vsel %vm706_vm1, %v719_v14, 0.0 }
  0xc0   : > { %724 = vadd.xlane.f32.xlu1 %v723_v15 }
 0x145   : > { %v722_v20 = vpop.xlane.xlu1 %721 }
 0x146   : > { %v726_v21 = vmul.f32 0.03125, %v722_v20 }
 0x148   : > { %v728_v22 = vadd.f32 1e-05, %v726_v21 }
 0x149   : > { %v725_v23 = vpop.xlane.xlu1 %724 }
 0x14a   : > { %3097 = vrsqrt.f32 %v728_v22  ;;  %v727_v24 = vmul.f32 0.03125, %v725_v23 }
 0x14c   : > { %v729_v25 = vadd.f32 1e-05, %v727_v24 }
 0x14e   : > { %3099 = vrsqrt.f32 %v729_v25 }
 0x157   : > { %v3098_v26 = vpop.eup %3097 }
 0x158   : > { %v732_v28 = vmul.f32 %v3098_v26, %v716_v8 }
 0x15a   : > { %v740_v30 = vmul.f32 %v2784_v27, %v732_v28 }
 0x15b   : > { %v3100_v31 = vpop.eup %3099 }
 0x15c   : > { %v733_v32 = vmul.f32 %v3100_v31, %v717_v12  ;;  %v3395_v33 = vadd.f32 %v2785_v29, %v740_v30 }
 0x15e   : > { %v741_v34 = vmul.f32 %v2784_v27, %v733_v32  ;;  %2909 = vmatprep.mubr.msk.f32.mxu1 %vm706_vm1, %v3395_v33 }
 0x160   : > { %v3399_v35 = vadd.f32 %v2785_v29, %v741_v34 }
 0x162   : > { %2910 = vmatmul.mubr.msk.f32.vlgmr.msra.gmra.mxu1 %vm706_vm1, %v3399_v35 }
 0x163   : > { %2914 = vmatprep.mubr.msk.f32.mxu1 %vm3194_vm2, %v3193_v36 }
 0x222   : > { %v2911_v37 = vpop.f32.mrf.mxu1 }
 0x223   : > { %v3422_v41 = vadd.f32 %v2911_v37, %v2786_v38 }
 0x224   : > { %v833_v39 = vpop.f32.mrf.mxu1 }
 0x225   : > { %v3414_v40 = vadd.f32 %v2786_v38, %v833_v39 }
 0x227   : > { %1010 = vrot.lane.b32.xlu1 %v3414_v40, %s3195_s30  ;;  %843 = vrot.lane.b32.xlu0 %v3414_v40, %s3196_s24 }
 0x22b   : > { %1008 = vrot.lane.b32.xlu1 %v3414_v40, %s3197_s25  ;;  %1174 = vrot.lane.b32.xlu0 %v3414_v40, %s3198_s20 }
 0x22f   : > { %1176 = vrot.lane.b32.xlu1 %v3414_v40, %s3199_s15  ;;  %1340 = vrot.lane.b32.xlu0 %v3414_v40, %s3200_s19 }
 0x233   : > { %1342 = vrot.lane.b32.xlu1 %v3414_v40, %s3201_s14  ;;  %1690 = vrot.lane.b32.xlu0 %v3422_v41, %s3195_s30  ;;  %s3206_s30 = smov 8  }
 0x237   : > { %1524 = vrot.lane.b32.xlu1 %v3422_v41, %s3196_s24  ;;  %1856 = vrot.lane.b32.xlu0 %v3422_v41, %s3199_s15  ;;  %s3207_s24 = smov 16  }
 0x23b   : > { %1688 = vrot.lane.b32.xlu1 %v3422_v41, %s3197_s25  ;;  %2022 = vrot.lane.b32.xlu0 %v3422_v41, %s3201_s14  ;;  %s3208_s25 = smov 24  }
 0x23f   : > { %1854 = vrot.lane.b32.xlu1 %v3422_v41, %s3198_s20 }
 0x243   : > { %2020 = vrot.lane.b32.xlu1 %v3422_v41, %s3200_s19  ;;  %s3711_s19 = scalar_lea.vmem %s3683_s6, %s3314_s23  ;;  %s3712_s23 = sld [smem:[#allocation12_spill]] (!%p2822_p6) }
 0x299   : > { %v1011_v42 = vpop.permute.xlu1 %1010  ;;  %v844_v43 = vpop.permute.xlu0 %843 }
 0x29a   : > { %2913 = vmatpush3.xpose.msk.msra.mxu1 %vm845_vm3, %v844_v43  ;;  %2923 = vmatpush3.xpose.msk.msra.mxu0 %vm845_vm3, %v1011_v42 }
 0x29b   : > { %2932 = vmatprep.subr.mxu0 %v3193_v36  ;;  %2917 = vmatprep.subr.mxu1 %v3193_v36 }
 0x29d   : > { %v1009_v44 = vpop.permute.xlu1 %1008  ;;  %2915 = vmatmul.mubr.msk.f32.vlgmr.msra.gmra.mxu1 %vm845_vm3, %v3414_v40  ;;  %v1175_v45 = vpop.permute.xlu0 %1174 }
 0x29e   : > { %2925 = vmatmul.mubr.msk.f32.vlgmr.msra.gmra.mxu0 %vm845_vm3, %v1009_v44  ;;  %2919 = vmatprep.mubr.msk.f32.mxu1 %vm3194_vm2, %v3193_v36 }
 0x29f   : > { %2934 = vmatprep.mubr.msk.f32.mxu0 %vm3194_vm2, %v3193_v36 }
 0x2a1   : > { %v1177_v46 = vpop.permute.xlu1 %1176  ;;  %v1341_v47 = vpop.permute.xlu0 %1340 }
 0x2a2   : > { %2933 = vmatpush3.xpose.msk.msra.mxu0 %vm845_vm3, %v1177_v46 }
 0x2a3   : > { %2942 = vmatprep.subr.mxu0 %v3193_v36 }
 0x2a5   : > { %v1343_v48 = vpop.permute.xlu1 %1342  ;;  %2935 = vmatmul.mubr.msk.f32.vlgmr.msra.gmra.mxu0 %vm845_vm3, %v1175_v45  ;;  %v1691_v49 = vpop.permute.xlu0 %1690 }
 0x2a6   : > { %2943 = vmatpush3.xpose.msk.msra.mxu0 %vm845_vm3, %v1343_v48  ;;  %2944 = vmatprep.mubr.msk.f32.mxu0 %vm3194_vm2, %v3193_v36 }
 0x2a7   : > { %2952 = vmatprep.subr.mxu0 %v3193_v36 }
 0x2a9   : > { %v1525_v50 = vpop.permute.xlu1 %1524  ;;  %2945 = vmatmul.mubr.msk.f32.vlgmr.msra.gmra.mxu0 %vm845_vm3, %v1341_v47  ;;  %v1857_v52 = vpop.permute.xlu0 %1856 }
 0x2aa   : > { %2953 = vmatpush3.xpose.msk.msra.mxu0 %vm845_vm3, %v1525_v50  ;;  %2954 = vmatprep.mubr.msk.f32.mxu0 %vm3194_vm2, %v3193_v36 }
 0x2ab   : > { %2962 = vmatprep.subr.mxu0 %v3193_v36 }
 0x2ad   : > { %v1689_v51 = vpop.permute.xlu1 %1688  ;;  %2955 = vmatmul.mubr.msk.f32.vlgmr.msra.gmra.mxu0 %vm845_vm3, %v3422_v41  ;;  %v2023_v54 = vpop.permute.xlu0 %2022 }
 0x2ae   : > { %2963 = vmatpush3.xpose.msk.msra.mxu0 %vm845_vm3, %v1691_v49  ;;  %2964 = vmatprep.mubr.msk.f32.mxu0 %vm3194_vm2, %v3193_v36 }
 0x2af   : > { %2972 = vmatprep.subr.mxu0 %v3193_v36 }
 0x2b1   : > { %2965 = vmatmul.mubr.msk.f32.vlgmr.msra.gmra.mxu0 %vm845_vm3, %v1689_v51  ;;  %v1855_v53 = vpop.permute.xlu1 %1854 }
 0x2b2   : > { %2973 = vmatpush3.xpose.msk.msra.mxu0 %vm845_vm3, %v1857_v52  ;;  %2974 = vmatprep.mubr.msk.f32.mxu0 %vm3194_vm2, %v3193_v36 }
 0x2b3   : > { %2982 = vmatprep.subr.mxu0 %v3193_v36 }
 0x2b5   : > { %2975 = vmatmul.mubr.msk.f32.vlgmr.msra.gmra.mxu0 %vm845_vm3, %v1855_v53  ;;  %v2021_v55 = vpop.permute.xlu1 %2020 }
 0x2b6   : > { %2983 = vmatpush3.xpose.msk.msra.mxu0 %vm845_vm3, %v2023_v54  ;;  %2984 = vmatprep.mubr.msk.f32.mxu0 %vm3194_vm2, %v3193_v36 }
 0x2b9   : > { %2985 = vmatmul.mubr.msk.f32.vlgmr.msra.gmra.mxu0 %vm845_vm3, %v2021_v55 }
 0x35d   : > { %v916_v56 = vpop.f32.mrf.mxu1 }
 0x35e   : > { %v920_v57 = vmul.f32 0.35355338, %v916_v56  ;;  %v1082_v58 = vpop.f32.mrf.mxu0 }
 0x35f   : > { %v1086_v59 = vmul.f32 0.35355338, %v1082_v58  ;;  %v2916_v60 = vpop.f32.mrf.mxu1 }
 0x360   : > { %v2926_v61 = vpop.f32.mrf.mxu0  ;;  %v921_v62 = vsel %vm845_vm3, %v920_v57, -inf }
 0x361   : > { %922 = vmax.xlane.f32.xlu0 %v921_v62  ;;  %v1087_v63 = vsel %vm845_vm3, %v1086_v59, -inf }
 0x362   : > { %1088 = vmax.xlane.f32.xlu1 %v1087_v63 }
 0x365   : > { %v1248_v0 = vpop.f32.mrf.mxu0 }
 0x366   : > { %v3473_v1 = vmul.f32 0.35355338, %v1248_v0 }
 0x367   : > { %v2936_v2 = vpop.f32.mrf.mxu0 }
 0x368   : > { %v1253_v3 = vsel %vm845_vm3, %v3473_v1, -inf }
 0x369   : > { %1254 = vmax.xlane.f32.xlu0 %v1253_v3  ;;  %v1414_v4 = vpop.f32.mrf.mxu0 }
 0x36a   : > { %v1418_v5 = vmul.f32 0.35355338, %v1414_v4 }
 0x36b   : > { %v2946_v6 = vpop.f32.mrf.mxu0 }
 0x36c   : > { %v1419_v7 = vsel %vm845_vm3, %v1418_v5, -inf }
 0x36d   : > { %1420 = vmax.xlane.f32.xlu0 %v1419_v7  ;;  %v1596_v8 = vpop.f32.mrf.mxu0 }
 0x36e   : > { %v1600_v9 = vmul.f32 0.35355338, %v1596_v8 }
 0x36f   : > { %v2956_v10 = vpop.f32.mrf.mxu0 }
 0x370   : > { %v1601_v11 = vsel %vm845_vm3, %v1600_v9, -inf }
 0x371   : > { %1602 = vmax.xlane.f32.xlu0 %v1601_v11  ;;  %v1762_v12 = vpop.f32.mrf.mxu0 }
 0x372   : > { %v1766_v13 = vmul.f32 0.35355338, %v1762_v12 }
 0x373   : > { %v2966_v14 = vpop.f32.mrf.mxu0 }
 0x374   : > { %v1767_v15 = vsel %vm845_vm3, %v1766_v13, -inf }
 0x375   : > { %1768 = vmax.xlane.f32.xlu1 %v1767_v15  ;;  %v1928_v16 = vpop.f32.mrf.mxu0 }
 0x376   : > { %v1932_v17 = vmul.f32 0.35355338, %v1928_v16 }
 0x377   : > { %v2976_v18 = vpop.f32.mrf.mxu0 }
 0x378   : > { %v1933_v19 = vsel %vm845_vm3, %v1932_v17, -inf }
 0x379   : > { %1934 = vmax.xlane.f32.xlu0 %v1933_v19  ;;  %v2094_v20 = vpop.f32.mrf.mxu0 }
 0x37a   : > { %v2098_v22 = vmul.f32 0.35355338, %v2094_v20 }
 0x37b   : > { %v2986_v21 = vpop.f32.mrf.mxu0 }
 0x37c   : > { %v2099_v23 = vsel %vm845_vm3, %v2098_v22, -inf }
 0x386   : > { %932 = vrot.lane.b32.xlu1 %v3414_v40, %s3202_s26 }
 0x3aa   : > { %2100 = vmax.xlane.f32.xlu1 %v2099_v23 }
 0x3bb   : > { %1264 = vrot.lane.b32.xlu1 %v3414_v40, %s3203_s22 }
 0x3bf   : > { %1430 = vrot.lane.b32.xlu1 %v3414_v40, %s3204_s29 }
 0x3c3   : > { %1612 = vrot.lane.b32.xlu1 %v3422_v41, %s3202_s26 }
 0x3ea   : > { %v923_v24 = vpop.xlane.xlu0 %922 }
 0x3eb   : > { %v924_v25 = vsub.f32 %v920_v57, %v923_v24  ;;  %v1089_v26 = vpop.xlane.xlu1 %1088 }
 0x3ec   : > { %v1090_v27 = vsub.f32 %v1086_v59, %v1089_v26 }
 0x3ed   : > { %v925_v28 = vmul.f32 1.442695, %v924_v25 }
 0x3ee   : > { %v1091_v29 = vmul.f32 1.442695, %v1090_v27 }
 0x3ef   : > { %3101 = vpow2.f32 %v925_v28 }
 0x3f0   : > { %3103 = vpow2.f32 %v1091_v29 }
 0x3f2   : > { %v1255_v30 = vpop.xlane.xlu0 %1254 }
 0x3f3   : > { %v1256_v47 = vsub.f32 %v3473_v1, %v1255_v30 }
 0x3f5   : > { %v1257_v49 = vmul.f32 1.442695, %v1256_v47 }
 0x3f6   : > { %v1421_v31 = vpop.xlane.xlu0 %1420 }
 0x3f7   : > { %v1422_v32 = vsub.f32 %v1418_v5, %v1421_v31 }
 0x3f9   : > { %v1423_v34 = vmul.f32 1.442695, %v1422_v32 }
 0x3fa   : > { %v1603_v48 = vpop.xlane.xlu0 %1602 }
 0x3fb   : > { %3105 = vpow2.f32 %v1423_v34  ;;  %v1604_v50 = vsub.f32 %v1600_v9, %v1603_v48  ;;  %v2202_v48 = vld [vmem:[%s3710_s17 + $0x8] sm:$0xff] }
 0x3fc   : > { %v3102_v37 = vpop.eup %3101  ;;  %3107 = vpow2.f32 %v1257_v49  ;;  %v2201_v49 = vld [vmem:[%s3710_s17] sm:$0xff] }
 0x3fd   : > { %v3488_v38 = vpop.eup %3103  ;;  %v927_v39 = vsel %vm845_vm3, %v3102_v37, 0.0  ;;  %v1605_v52 = vmul.f32 1.442695, %v1604_v50 }
 0x3fe   : > { %v1769_v42 = vpop.xlane.xlu1 %1768  ;;  %928 = vadd.xlane.f32.xlu0 %v927_v39  ;;  %v1093_v43 = vsel %vm845_vm3, %v3488_v38, 0.0 }
 0x3ff   : > { %1094 = vadd.xlane.f32.xlu1 %v1093_v43  ;;  %3109 = vpow2.f32 %v1605_v52  ;;  %v1770_v54 = vsub.f32 %v1766_v13, %v1769_v42 }
 0x401   : > { %v1771_v56 = vmul.f32 1.442695, %v1770_v54 }
 0x402   : > { %v933_v44 = vpop.permute.xlu1 %932  ;;  %v1935_v51 = vpop.xlane.xlu0 %1934 }
 0x403   : > { %2918 = vmatpush3.msra.mxu1 %v933_v44  ;;  %v1936_v53 = vsub.f32 %v1932_v17, %v1935_v51 }
 0x404   : > { %2927 = vmatprep.subr.mxu1 %v3193_v36 }
 0x405   : > { %v1937_v55 = vmul.f32 1.442695, %v1936_v53 }
 0x407   : > { %3111 = vpow2.f32 %v1937_v55 }
 0x408   : > { %v3494_v45 = vpop.eup %3105  ;;  %3113 = vpow2.f32 %v1771_v56 }
 0x409   : > { %v1425_v46 = vsel %vm845_vm3, %v3494_v45, 0.0  ;;  %v3108_v57 = vpop.eup %3107 }
 0x40a   : > { %1426 = vadd.xlane.f32.xlu1 %v1425_v46  ;;  %v2203_v46 = vld [vmem:[%s3710_s17 + $0x10] sm:$0xff] }
 0x40c   : > { %v3502_v58 = vpop.eup %3109 }
 0x40d   : > { %v1607_v62 = vsel %vm845_vm3, %v3502_v58, 0.0 }
 0x414   : > { %1098 = vrot.lane.b32.xlu0 %v3414_v40, %s3205_s28  ;;  %v1259_v40 = vsel %vm845_vm3, %v3108_v57, 0.0  ;;  %v3506_v63 = vpop.eup %3111 }
 0x415   : > { %v1939_v0 = vsel %vm845_vm3, %v3506_v63, 0.0  ;;  %v3114_v1 = vpop.eup %3113 }
 0x416   : > { %v1773_v2 = vsel %vm845_vm3, %v3114_v1, 0.0 }
 0x41b   : > { %1778 = vrot.lane.b32.xlu1 %v3422_v41, %s3205_s28 }
 0x433   : > { %v2101_v59 = vpop.xlane.xlu1 %2100  ;;  %1260 = vadd.xlane.f32.xlu0 %v1259_v40 }
 0x434   : > { %v2102_v60 = vsub.f32 %v2098_v22, %v2101_v59 }
 0x436   : > { %v2103_v61 = vmul.f32 1.442695, %v2102_v60 }
 0x437   : > { %1608 = vadd.xlane.f32.xlu0 %v1607_v62  ;;  %v1265_v5 = vpop.permute.xlu1 %1264 }
 0x438   : > { %3115 = vpow2.f32 %v2103_v61 }
 0x43b   : > { %1940 = vadd.xlane.f32.xlu0 %v1939_v0  ;;  %v1431_v6 = vpop.permute.xlu1 %1430 }
 0x43f   : > { %1774 = vadd.xlane.f32.xlu1 %v1773_v2  ;;  %v1613_v7 = vpop.permute.xlu1 %1612 }
 0x445   : > { %v3511_v3 = vpop.eup %3115 }
 0x446   : > { %v2105_v4 = vsel %vm845_vm3, %v3511_v3, 0.0 }
 0x447   : > { %2106 = vadd.xlane.f32.xlu0 %v2105_v4 }
 0x450   : > { %2110 = vrot.lane.b32.xlu1 %v3422_v41, %s3204_s29 }
 0x45d   : > { %1944 = vrot.lane.b32.xlu0 %v3422_v41, %s3203_s22 }
 0x487   : > { %v929_v8 = vpop.xlane.xlu0 %928 }
 0x488   : > { %3117 = vrcp.f32 %v929_v8  ;;  %v1095_v9 = vpop.xlane.xlu1 %1094 }
 0x489   : > { %3119 = vrcp.f32 %v1095_v9 }
 0x48b   : > { %v1099_v13 = vpop.permute.xlu0 %1098 }
 0x493   : > { %v1427_v14 = vpop.xlane.xlu1 %1426 }
 0x495   : > { %v3118_v10 = vpop.eup %3117 }
 0x496   : > { %v931_v11 = vmul.f32 %v3118_v10, %v3102_v37  ;;  %v3120_v12 = vpop.eup %3119 }
 0x497   : > { %v1097_v41 = vmul.f32 %v3120_v12, %v3488_v38  ;;  %v1779_v17 = vpop.permute.xlu1 %1778 }
 0x498   : > { %2920 = vmatmul.mubr.msk.f32.vlgmr.msra.gmra.mxu1 %vm845_vm3, %v931_v11 }
 0x499   : > { %2928 = vmatpush3.msra.mxu1 %v1099_v13  ;;  %2929 = vmatprep.mubr.msk.f32.mxu1 %vm3194_vm2, %v3193_v36 }
 0x49a   : > { %2937 = vmatprep.subr.mxu1 %v3193_v36 }
 0x49c   : > { %2930 = vmatmul.mubr.msk.f32.vlgmr.msra.gmra.mxu1 %vm845_vm3, %v1097_v41 }
 0x49d   : > { %2938 = vmatpush3.msra.mxu1 %v1265_v5  ;;  %2939 = vmatprep.mubr.msk.f32.mxu1 %vm3194_vm2, %v3193_v36 }
 0x49e   : > { %2947 = vmatprep.subr.mxu1 %v3193_v36 }
 0x4bc   : > { %v1261_v15 = vpop.xlane.xlu0 %1260 }
 0x4bd   : > { %3121 = vrcp.f32 %v1261_v15 }
 0x4be   : > { %3123 = vrcp.f32 %v1427_v14 }
 0x4c0   : > { %v1609_v16 = vpop.xlane.xlu0 %1608 }
 0x4c1   : > { %3125 = vrcp.f32 %v1609_v16 }
 0x4c4   : > { %v1941_v18 = vpop.xlane.xlu0 %1940 }
 0x4c8   : > { %v1775_v19 = vpop.xlane.xlu1 %1774 }
 0x4c9   : > { %3127 = vrcp.f32 %v1775_v19 }
 0x4ca   : > { %v3122_v20 = vpop.eup %3121  ;;  %3129 = vrcp.f32 %v1941_v18 }
 0x4cb   : > { %v1263_v21 = vmul.f32 %v3122_v20, %v3108_v57  ;;  %v3124_v22 = vpop.eup %3123 }
 0x4cc   : > { %v1429_v23 = vmul.f32 %v3124_v22, %v3494_v45  ;;  %v2111_v32 = vpop.permute.xlu1 %2110  ;;  %v2204_v45 = vld [vmem:[%s3710_s17 + $0x18] sm:$0xff]  ;;  %s3713_s17 = sld [smem:[#allocation13_spill]] (!%p2822_p6) }
 0x4cd   : > { %2940 = vmatmul.mubr.msk.f32.vlgmr.msra.gmra.mxu1 %vm845_vm3, %v1263_v21  ;;  %v2342_v22 = vld [vmem:[%s3354_s3 + $0x18] sm:$0xff] }
 0x4ce   : > { %2948 = vmatpush3.msra.mxu1 %v1431_v6  ;;  %2949 = vmatprep.mubr.msk.f32.mxu1 %vm3194_vm2, %v3193_v36  ;;  %v3126_v24 = vpop.eup %3125  ;;  %v2813_v6 = vld [vmem:[%s3711_s19] ss:$0 sm:$0xff] }
 0x4cf   : > { %2957 = vmatprep.subr.mxu1 %v3193_v36  ;;  %v1611_v26 = vmul.f32 %v3126_v24, %v3502_v58  ;;  %v2340_v24 = vld [vmem:[%s3354_s3 + $0x8] sm:$0xff] }
 0x4d0   : > { %v2107_v25 = vpop.xlane.xlu0 %2106 }
 0x4d1   : > { %3131 = vrcp.f32 %v2107_v25  ;;  %2950 = vmatmul.mubr.msk.f32.vlgmr.msra.gmra.mxu1 %vm845_vm3, %v1429_v23  ;;  %v2341_v23 = vld [vmem:[%s3354_s3 + $0x10] sm:$0xff]  ;;  %v2339_v25 = vld [vmem:[%s3354_s3] sm:$0xff] }
 0x4d2   : > { %2958 = vmatpush3.msra.mxu1 %v1613_v7  ;;  %2959 = vmatprep.mubr.msk.f32.mxu1 %vm3194_vm2, %v3193_v36 }
 0x4d3   : > { %2967 = vmatprep.subr.mxu1 %v3193_v36 }
 0x4d4   : > { %v1945_v30 = vpop.permute.xlu0 %1944 }
 0x4d5   : > { %2960 = vmatmul.mubr.msk.f32.vlgmr.msra.gmra.mxu1 %vm845_vm3, %v1611_v26  ;;  %v2448_v26 = vld [vmem:[%s3364_s27 + $0x78] sm:$0xff] }
 0x4d6   : > { %v3128_v27 = vpop.eup %3127  ;;  %2968 = vmatpush3.msra.mxu1 %v1779_v17  ;;  %2969 = vmatprep.mubr.msk.f32.mxu1 %vm3194_vm2, %v3193_v36 }
 0x4d7   : > { %2977 = vmatprep.subr.mxu1 %v3193_v36  ;;  %v1777_v28 = vmul.f32 %v3128_v27, %v3114_v1  ;;  %v3130_v29 = vpop.eup %3129  ;;  %v2447_v27 = vld [vmem:[%s3364_s27 + $0x70] sm:$0xff]  ;;  %3014 = vmatprep.subr.mxu0 %v2448_v26 }
 0x4d8   : > { %v1943_v31 = vmul.f32 %v3130_v29, %v3506_v63  ;;  %3015 = vmatpush3.msra.mxu0 %v2448_v26  ;;  %v2445_v29 = vld [vmem:[%s3364_s27 + $0x60] sm:$0xff] }
 0x4d9   : > { %2970 = vmatmul.mubr.msk.f32.vlgmr.msra.gmra.mxu1 %vm845_vm3, %v1777_v28  ;;  %v2446_v28 = vld [vmem:[%s3364_s27 + $0x68] sm:$0xff]  ;;  %3016 = vmatprep.subr.mxu0 %v2447_v27 }
 0x4da   : > { %2978 = vmatpush3.msra.mxu1 %v1945_v30  ;;  %2979 = vmatprep.mubr.msk.f32.mxu1 %vm3194_vm2, %v3193_v36  ;;  %v2444_v30 = vld [vmem:[%s3364_s27 + $0x58] sm:$0xff] }
 0x4db   : > { %2987 = vmatprep.subr.mxu1 %v3193_v36  ;;  %3017 = vmatpush3.msra.mxu0 %v2447_v27 }
 0x4dc   : > { %3018 = vmatprep.subr.mxu0 %v2446_v28 }
 0x4dd   : > { %2980 = vmatmul.mubr.msk.f32.vlgmr.msra.gmra.mxu1 %vm845_vm3, %v1943_v31  ;;  %3019 = vmatpush3.msra.mxu0 %v2446_v28  ;;  %v2443_v31 = vld [vmem:[%s3364_s27 + $0x50] sm:$0xff] }
 0x4de   : > { %v3132_v34 = vpop.eup %3131  ;;  %2988 = vmatpush3.msra.mxu1 %v2111_v32  ;;  %2989 = vmatprep.mubr.msk.f32.mxu1 %vm3194_vm2, %v3193_v36  ;;  %v2442_v32 = vld [vmem:[%s3364_s27 + $0x48] sm:$0xff] }
 0x4df   : > { %v2109_v37 = vmul.f32 %v3132_v34, %v3511_v3  ;;  %2992 = vmatprep.subr.mxu1 %v2204_v45  ;;  %3020 = vmatprep.subr.mxu0 %v2445_v29  ;;  %v2441_v34 = vld [vmem:[%s3364_s27 + $0x40] sm:$0xff] }
 0x4e0   : > { %3021 = vmatpush3.msra.mxu0 %v2445_v29 }
 0x4e1   : > { %2990 = vmatmul.mubr.msk.f32.vlgmr.msra.gmra.mxu1 %vm845_vm3, %v2109_v37  ;;  %3022 = vmatprep.subr.mxu0 %v2444_v30  ;;  %v2440_v37 = vld [vmem:[%s3364_s27 + $0x38] sm:$0xff] }
 0x4e2   : > { %2993 = vmatpush3.msra.mxu1 %v2204_v45  ;;  %3023 = vmatpush3.msra.mxu0 %v2444_v30 }
 0x4e3   : > { %2994 = vmatprep.subr.mxu1 %v2203_v46  ;;  %3024 = vmatprep.subr.mxu0 %v2443_v31 }
 0x4e4   : > { %2995 = vmatpush3.msra.mxu1 %v2203_v46  ;;  %3025 = vmatpush3.msra.mxu0 %v2443_v31 }
 0x4e5   : > { %2996 = vmatprep.subr.mxu1 %v2202_v48  ;;  %3026 = vmatprep.subr.mxu0 %v2442_v32 }
 0x4e6   : > { %2997 = vmatpush3.msra.mxu1 %v2202_v48  ;;  %3027 = vmatpush3.msra.mxu0 %v2442_v32 }
 0x4e7   : > { %2998 = vmatprep.subr.mxu1 %v2201_v49  ;;  %3028 = vmatprep.subr.mxu0 %v2441_v34 }
 0x4e8   : > { %2999 = vmatpush3.msra.mxu1 %v2201_v49  ;;  %3029 = vmatpush3.msra.mxu0 %v2441_v34  ;;  %v2816_v49 = vld [vmem:[%s672_s13] ss:$0 sm:$0xff] }
 0x4e9   : > { %3003 = vmatprep.subr.mxu1 %v2342_v22  ;;  %3030 = vmatprep.subr.mxu0 %v2440_v37 }
 0x4ea   : > { %3031 = vmatpush3.msra.mxu0 %v2440_v37 }
 0x558   : > { %v1004_v38 = vpop.f32.mrf.mxu1 }
 0x55a   : > { %v2921_v39 = vpop.f32.mrf.mxu1 }
 0x55b   : > { %v2438_v39 = vld [vmem:[%s3364_s27 + $0x28] sm:$0xff] }
 0x55c   : > { %v1170_v42 = vpop.f32.mrf.mxu1 }
 0x55d   : > { %1507 = vrot.lane.b32.xlu0 %v1170_v42, %s3206_s30  ;;  %v2437_v42 = vld [vmem:[%s3364_s27 + $0x20] sm:$0xff] }
 0x55e   : > { %v2931_v43 = vpop.f32.mrf.mxu1 }
 0x58d   : > { %v1336_v44 = vpop.f32.mrf.mxu1 }
 0x58e   : > { %1511 = vrot.lane.b32.xlu1 %v1336_v44, %s3207_s24 }
 0x58f   : > { %v2941_v36 = vpop.f32.mrf.mxu1 }
 0x591   : > { %v1502_v47 = vpop.f32.mrf.mxu1 }
 0x592   : > { %1515 = vrot.lane.b32.xlu1 %v1502_v47, %s3208_s25 }
 0x593   : > { %v2951_v50 = vpop.f32.mrf.mxu1 }
 0x595   : > { %v1684_v51 = vpop.f32.mrf.mxu1 }
 0x597   : > { %v2961_v52 = vpop.f32.mrf.mxu1 }
 0x599   : > { %v1850_v53 = vpop.f32.mrf.mxu1 }
 0x59a   : > { %2187 = vrot.lane.b32.xlu0 %v1850_v53, %s3206_s30 }
 0x59b   : > { %v2971_v54 = vpop.f32.mrf.mxu1 }
 0x59d   : > { %v2016_v55 = vpop.f32.mrf.mxu1 }
 0x59e   : > { %2191 = vrot.lane.b32.xlu0 %v2016_v55, %s3207_s24 }
 0x59f   : > { %v2981_v56 = vpop.f32.mrf.mxu1 }
 0x5a1   : > { %v2182_v57 = vpop.f32.mrf.mxu1 }
 0x5a2   : > { %2195 = vrot.lane.b32.xlu1 %v2182_v57, %s3208_s25 }
 0x5a3   : > { %v2991_v40 = vpop.f32.mrf.mxu1 }
 0x5a4   : > { %v2436_v40 = vld [vmem:[%s3364_s27 + $0x18] sm:$0xff] }
 0x5cf   : > { %v1508_v58 = vpop.permute.xlu0 %1507 }
 0x5d0   : > { %v1518_v60 = vsel %vm845_vm3, %v1004_v38, %v1508_v58  ;;  %v2439_v38 = vld [vmem:[%s3364_s27 + $0x30] sm:$0xff] }
 0x5d1   : > { %3032 = vmatprep.subr.mxu0 %v2439_v38  ;;  %v2435_v58 = vld [vmem:[%s3364_s27 + $0x10] sm:$0xff] }
 0x5d2   : > { %3033 = vmatpush3.msra.mxu0 %v2439_v38 }
 0x5d3   : > { %3034 = vmatprep.subr.mxu0 %v2438_v39 }
 0x5d4   : > { %3035 = vmatpush3.msra.mxu0 %v2438_v39 }
 0x5d5   : > { %3036 = vmatprep.subr.mxu0 %v2437_v42 }
 0x5d6   : > { %3037 = vmatpush3.msra.mxu0 %v2437_v42 }
 0x5d7   : > { %3038 = vmatprep.subr.mxu0 %v2436_v40 }
 0x5d8   : > { %3039 = vmatpush3.msra.mxu0 %v2436_v40 }
 0x5d9   : > { %3040 = vmatprep.subr.mxu0 %v2435_v58 }
 0x5da   : > { %3041 = vmatpush3.msra.mxu0 %v2435_v58 }
 0x600   : > { %v1512_v59 = vpop.permute.xlu1 %1511 }
 0x601   : > { %v1520_v61 = vsel %vm1519_vm4, %v1518_v60, %v1512_v59  ;;  %v2434_v59 = vld [vmem:[%s3364_s27 + $0x8] sm:$0xff]  ;;  %v2433_v60 = vld [vmem:[%s3364_s27] sm:$0xff] }
 0x602   : > { %3042 = vmatprep.subr.mxu0 %v2434_v59 }
 0x603   : > { %3043 = vmatpush3.msra.mxu0 %v2434_v59 }
 0x604   : > { %v1516_v62 = vpop.permute.xlu1 %1515  ;;  %3044 = vmatprep.subr.mxu0 %v2433_v60 }
 0x605   : > { %v1522_v63 = vsel %vm1521_vm5, %v1520_v61, %v1516_v62  ;;  %3045 = vmatpush3.msra.mxu0 %v2433_v60  ;;  %v2818_v61 = vld [vmem:[%s683_s5] ss:$0 sm:$0xff] }
 0x606   : > { %3000 = vmatprep.mubr.msk.f32.mxu1 %vm706_vm1, %v1522_v63 }
 0x60c   : > { %v2188_v0 = vpop.permute.xlu0 %2187 }
 0x60d   : > { %v2198_v2 = vsel %vm845_vm3, %v1684_v51, %v2188_v0  ;;  %v2817_v51 = vld [vmem:[%s675_s21] ss:$0 sm:$0xff] }
 0x610   : > { %v2192_v1 = vpop.permute.xlu0 %2191 }
 0x611   : > { %v2199_v3 = vsel %vm1519_vm4, %v2198_v2, %v2192_v1 }
 0x614   : > { %v2196_v4 = vpop.permute.xlu1 %2195 }
 0x615   : > { %v2200_v5 = vsel %vm1521_vm5, %v2199_v3, %v2196_v4  ;;  %v2821_v4 = vld [vmem:[%s691_s16] ss:$0 sm:$0xff] }
 0x616   : > { %3001 = vmatmul.mubr.msk.f32.vlgmr.msra.gmra.mxu1 %vm706_vm1, %v2200_v5 }
 0x617   : > { %3004 = vmatpush3.msra.mxu1 %v2342_v22 }
 0x618   : > { %3005 = vmatprep.subr.mxu1 %v2341_v23 }
 0x619   : > { %3006 = vmatpush3.msra.mxu1 %v2341_v23 }
 0x61a   : > { %3007 = vmatprep.subr.mxu1 %v2340_v24 }
 0x61b   : > { %3008 = vmatpush3.msra.mxu1 %v2340_v24 }
 0x61c   : > { %3009 = vmatprep.subr.mxu1 %v2339_v25 }
 0x61d   : > { %3010 = vmatpush3.msra.mxu1 %v2339_v25 }
 0x6d6   : > { %v3002_v7 = vpop.f32.mrf.mxu1 }
 0x6d7   : > { %v2290_v8 = vadd.f32 %v3002_v7, %v2813_v6 }
 0x6d8   : > { %v2284_v9 = vpop.f32.mrf.mxu1 }
 0x6d9   : > { %v3568_v10 = vadd.f32 %v2290_v8, %v3399_v35  ;;  %v2285_v11 = vadd.f32 %v2813_v6, %v2284_v9 }
 0x6db   : > { %v3571_v12 = vadd.f32 %v2285_v11, %v3395_v33  ;;  %v2300_v13 = vsel %vm706_vm1, %v3568_v10, 0.0 }
 0x6dc   : > { %2301 = vadd.xlane.f32.xlu1 %v2300_v13 }
 0x6dd   : > { %v2297_v41 = vsel %vm706_vm1, %v3571_v12, 0.0 }
 0x6de   : > { %2298 = vadd.xlane.f32.xlu0 %v2297_v41 }
 0x765   : > { %v2302_v14 = vpop.xlane.xlu1 %2301 }
 0x766   : > { %v2304_v15 = vmul.f32 0.03125, %v2302_v14 }
 0x767   : > { %v2299_v16 = vpop.xlane.xlu0 %2298 }
 0x768   : > { %v2303_v35 = vmul.f32 0.03125, %v2299_v16  ;;  %v3578_v17 = vsub.f32 %v3568_v10, %v2304_v15 }
 0x76a   : > { %v3581_v33 = vsub.f32 %v3571_v12, %v2303_v35  ;;  %v2308_v20 = vmul.f32 %v3578_v17, %v3578_v17 }
 0x76c   : > { %v2307_v18 = vmul.f32 %v3581_v33, %v3581_v33  ;;  %v2312_v21 = vsel %vm706_vm1, %v2308_v20, 0.0 }
 0x76e   : > { %v2309_v19 = vsel %vm706_vm1, %v2307_v18, 0.0 }
 0x76f   : > { %2310 = vadd.xlane.f32.xlu0 %v2309_v19 }
 0x773   : > { %2313 = vadd.xlane.f32.xlu0 %v2312_v21 }
 0x7f8   : > { %v2311_v43 = vpop.xlane.xlu0 %2310 }
 0x7f9   : > { %v2315_v44 = vmul.f32 0.03125, %v2311_v43 }
 0x7fb   : > { %v2317_v45 = vadd.f32 1e-05, %v2315_v44 }
 0x7fc   : > { %v2314_v46 = vpop.xlane.xlu0 %2313 }
 0x7fd   : > { %3133 = vrsqrt.f32 %v2317_v45  ;;  %v2316_v36 = vmul.f32 0.03125, %v2314_v46 }
 0x7ff   : > { %v2318_v47 = vadd.f32 1e-05, %v2316_v36 }
 0x801   : > { %3135 = vrsqrt.f32 %v2318_v47 }
 0x80a   : > { %v3134_v48 = vpop.eup %3133 }
 0x80b   : > { %v2321_v50 = vmul.f32 %v3134_v48, %v3581_v33 }
 0x80d   : > { %v2329_v52 = vmul.f32 %v2816_v49, %v2321_v50 }
 0x80e   : > { %v3136_v53 = vpop.eup %3135 }
 0x80f   : > { %v2322_v54 = vmul.f32 %v3136_v53, %v3578_v17  ;;  %v2337_v55 = vadd.f32 %v2817_v51, %v2329_v52 }
 0x811   : > { %v2330_v56 = vmul.f32 %v2816_v49, %v2322_v54  ;;  %3011 = vmatprep.mubr.msk.f32.mxu1 %vm706_vm1, %v2337_v55 }
 0x813   : > { %v2338_v57 = vadd.f32 %v2817_v51, %v2330_v56 }
 0x815   : > { %3012 = vmatmul.mubr.msk.f32.vlgmr.msra.gmra.mxu1 %vm706_vm1, %v2338_v57 }
 0x8d5   : > { %v3013_v62 = vpop.f32.mrf.mxu1 }
 0x8d6   : > { %v2428_v63 = vadd.f32 %v3013_v62, %v2818_v61 }
 0x8d7   : > { %v2422_v0 = vpop.f32.mrf.mxu1 }
 0x8d8   : > { %v2423_v1 = vadd.f32 %v2818_v61, %v2422_v0  ;;  %v2432_v3 = vmax.f32 %v2428_v63, 0.0 }
 0x8da   : > { %v2431_v2 = vmax.f32 %v2423_v1, 0.0 }
 0x8dc   : > { %3046 = vmatprep.mubr.f32.mxu0 %v2431_v2 }
 0x8dd   : > { %3047 = vmatmul.mubr.f32.vlgmr.msra.gmra.mxu0 %v2432_v3 }
 0x99d   : > { %v3048_v5 = vpop.f32.mrf.mxu0 }
 0x99e   : > { %v2528_v6 = vadd.f32 %v3048_v5, %v2821_v4 }
 0x99f   : > { %v2522_v7 = vpop.f32.mrf.mxu0 }
 0x9a0   : > { %v2532_v8 = vadd.f32 %v2528_v6, %v3568_v10  ;;  %v2523_v9 = vadd.f32 %v2821_v4, %v2522_v7  ;;  %2538 = sbr.rel (%p2822_p6) target bundleno = 2782 (0xade), region = 88 }
 0x9a2   : > { %2534 = vst.msk [vmem:[#allocation2 + $0x8] sm:$0xff] %vm706_vm1, %v2532_v8  ;;  %v2531_v11 = vadd.f32 %v2523_v9, %v3571_v12 }
 0x9a4   : > { %2533 = vst.msk [vmem:[#allocation2] sm:$0xff] %vm706_vm1, %v2531_v11 }
 0x9a5   : > { %v2541_v13 = vsel %vm706_vm1, %v2531_v11, 0.0  ;;  %v2544_v41 = vsel %vm706_vm1, %v2532_v8, 0.0  ;;  %v2823_v27 = vld [vmem:[%s3712_s23] ss:$0 sm:$0xff] }
 0x9a6   : > { %2542 = vadd.xlane.f32.xlu0 %v2541_v13  ;;  %v2824_v29 = vld [vmem:[%s3713_s17] ss:$0 sm:$0xff] }
 0x9aa   : > { %2545 = vadd.xlane.f32.xlu0 %v2544_v41 }
 0xa2f   : > { %v2543_v14 = vpop.xlane.xlu0 %2542 }
 0xa30   : > { %v2547_v15 = vmul.f32 0.03125, %v2543_v14 }
 0xa32   : > { %v2549_v16 = vsub.f32 %v2531_v11, %v2547_v15 }
 0xa33   : > { %v2546_v10 = vpop.xlane.xlu0 %2545 }
 0xa34   : > { %v2548_v35 = vmul.f32 0.03125, %v2546_v10  ;;  %v2551_v17 = vmul.f32 %v2549_v16, %v2549_v16 }
 0xa36   : > { %v2550_v33 = vsub.f32 %v2532_v8, %v2548_v35  ;;  %v2553_v12 = vsel %vm706_vm1, %v2551_v17, 0.0 }
 0xa37   : > { %2554 = vadd.xlane.f32.xlu1 %v2553_v12 }
 0xa38   : > { %v2552_v18 = vmul.f32 %v2550_v33, %v2550_v33 }
 0xa3a   : > { %v2556_v19 = vsel %vm706_vm1, %v2552_v18, 0.0 }
 0xa3b   : > { %2557 = vadd.xlane.f32.xlu1 %v2556_v19 }
 0xac0   : > { %v2555_v20 = vpop.xlane.xlu1 %2554 }
 0xac1   : > { %v2559_v21 = vmul.f32 0.03125, %v2555_v20 }
 0xac3   : > { %v2561_v22 = vadd.f32 1e-05, %v2559_v21 }
 0xac4   : > { %v2558_v23 = vpop.xlane.xlu1 %2557 }
 0xac5   : > { %3137 = vrsqrt.f32 %v2561_v22  ;;  %v2560_v24 = vmul.f32 0.03125, %v2558_v23 }
 0xac7   : > { %v2562_v25 = vadd.f32 1e-05, %v2560_v24 }
 0xac9   : > { %3139 = vrsqrt.f32 %v2562_v25 }
 0xad2   : > { %v3138_v26 = vpop.eup %3137 }
 0xad3   : > { %v2565_v28 = vmul.f32 %v3138_v26, %v2549_v16 }
 0xad5   : > { %v2573_v30 = vmul.f32 %v2823_v27, %v2565_v28 }
 0xad6   : > { %v3140_v31 = vpop.eup %3139 }
 0xad7   : > { %v2581_v32 = vadd.f32 %v2824_v29, %v2573_v30  ;;  %v2566_v34 = vmul.f32 %v3140_v31, %v2550_v33 }
 0xad9   : > { %2583 = vst.msk [vmem:[#allocation3] sm:$0xff] %vm706_vm1, %v2581_v32  ;;  %v2574_v37 = vmul.f32 %v2823_v27, %v2566_v34 }
 0xadb   : > { %v2582_v38 = vadd.f32 %v2824_v29, %v2574_v37 }
 0xadd   : > { %2584 = vst.msk [vmem:[#allocation3 + $0x8] sm:$0xff] %vm706_vm1, %v2582_v38 }
 0xade PF: > { %s3714_s24 = sld [smem:[#allocation7_spill]]  ;;  %s3209_s15 = smov [#allocation3]  }
 0xadf   : > { %s2594_s19 = sshll.u32 %s3209_s15, 4  ;;  %s2595_s19 = int_to_ptr.vmem [resolvable:$true] %s2594_s19 }
 0xae0   : > { %s3141_s3 = scalar_lea.vmem %s2595_s19, 256  ;;  %p3148_p11 = scmp.lt.s32.totalorder %s2595_s19, %s2595_s19 }
 0xae1   : > { %p3142_p8 = scmp.ne.s32.totalorder %s2595_s19, %s3141_s3  ;;  %p3149_p12 = scmp.lt.s32.totalorder %s3141_s3, %s3141_s3 }
 0xae3   : > { %p3150_p13 = por %p3149_p12, %p3148_p11 }
 0xae4   : > { %s3715_s25 = sadd.s32 4294967295, %s3714_s24  }
 0xae5   : > { %p3652_p7 = scmp.eq.s32.totalorder %s3715_s25, 1 }
 0xae7   : > { %p3143_p9 = pnand %p3142_p8, %p3652_p7 }
 0xae9   : > { %p3144_p10 = pneg %p3143_p9 }
 0xaeb   : > { %p3151_p0 = pnand %p3150_p13, %p3144_p10 }
 0xaed   : > { %3154 = shalt.err (!%p3151_p0)
}
 0xaee   : > { %s3210_s14 = smov 128   ;;  %s3717_s13 = sld [smem:[#allocation14_spill]] }
 0xaf4   : > { %3050 = dma.vmem_to_hbm [thread:$0]  (%p3652_p7), %s2595_s19, 256, %s3717_s13, [#allocation4], %s3210_s14, %s3210_s14, %s3206_s30  }
 0xaf5   : > { %3178 = dma.done.wait (%p3652_p7), [#allocation4], 256  }
 0xaf6   : > { %3180 = vsyncadd (%p3652_p7), [#allocation4], 4294967040 }
 0xaf7 PF: > { %s3718_s21 = sld [smem:[#allocation7_spill]] }
 0xaf8   : > { %s3719_s18 = sld [smem:[#allocation6_spill]] }
 0xaf9   : > { %s3720_s19 = sld [smem:[#allocation8_spill]] }
 0xafd   : > { %s26_s20 = sadd.s32 1, %s3718_s21  }
 0xafe   : > { %p23_p1 = scmp.ge.s32.totalorder %s26_s20, 4  }
 0xb00   :  { %25 = sbr.rel (!%p23_p1) target bundleno = 8 (0x8), region = 152 }
 0xb05   :  { %2610 = vsyncpa [#allocation4], 1 }
 0xb06   :  { %2612 = vsyncpa [#allocation4 + $0x1], 1 }

</bundles_post_ra>
